<compile_context>
chip_gen: v5e
topology: v5e:2x2
jax: 0.10.0
libtpu: 0.0.40
codegen_flags: <defaults>
</compile_context>

<pallas_src>
import math
from functools import partial

import jax
import jax.numpy as jnp
from jax.experimental import pallas as pl
from jax.experimental.pallas import tpu as pltpu


NEG_INF = -1e9


# ----------------------------------------------------------------------------
# Kernel
# ----------------------------------------------------------------------------
def _layer_norm(x, g, b, eps=1e-5):
    mu = jnp.mean(x, axis=-1, keepdims=True)
    var = jnp.mean((x - mu) ** 2, axis=-1, keepdims=True)
    return (x - mu) * jax.lax.rsqrt(var + eps) * g + b


def fused_transformer_kernel(
        xin_ref, qid_ref, kcode_ref, win_ref, bin_ref,
        wq_ref, bq_ref, wk_ref, bk_ref, wv_ref, bv_ref, wo_ref, bo_ref,
        g1_ref, be1_ref, w1_ref, bf1_ref, w2_ref, bf2_ref, g2_ref, be2_ref,
        wp_ref, bp_ref,
        out_ref, x_scr, *, num_heads):
    """One (batch-tile, layer) grid step.

    Grid = (nt, L); layer axis is the inner ("arbitrary") axis so per-layer
    weights stream through VMEM with automatic 2-deep prefetch while the
    activations `x_scr` stay resident in VMEM scratch across the whole depth.
    """
    l = pl.program_id(1)
    R, D = x_scr.shape
    H = num_heads
    dh = D // H
    scale = jnp.float32(1.0 / math.sqrt(dh))

    # ---- first layer step: fused cat+num input projection (one matmul) ------
    @pl.when(l == 0)
    def _():
        x_scr[...] = (jnp.dot(xin_ref[...], win_ref[...],
                              preferred_element_type=jnp.float32)
                      + bin_ref[...])                           # (R, D) f32

    x = x_scr[...]                                              # (R, D) f32

    # ---- additive attention bias rebuilt in-kernel (block-diagonal same-batch
    #      mask + key padding): one broadcast compare + where, no R^2 HBM DMA --
    bias = jnp.where(qid_ref[...] == kcode_ref[0], 0.0, NEG_INF)  # (R, R) f32

    # ---- multi-head self-attention: full-width lane-dense projections -------
    xb = x.astype(jnp.bfloat16)
    q = jnp.dot(xb, wq_ref[0], preferred_element_type=jnp.float32) + bq_ref[0]
    k = jnp.dot(xb, wk_ref[0], preferred_element_type=jnp.float32) + bk_ref[0]
    v = jnp.dot(xb, wv_ref[0], preferred_element_type=jnp.float32) + bv_ref[0]

    qb = q.astype(jnp.bfloat16)
    kb = k.astype(jnp.bfloat16)
    vb = v.astype(jnp.bfloat16)

    dims = (((1,), (1,)), ((), ()))          # q @ k^T without an explicit .T
    ctx_parts = []
    for h in range(H):                       # static unroll over heads
        lo, hi = h * dh, (h + 1) * dh
        s = jax.lax.dot_general(qb[:, lo:hi], kb[:, lo:hi], dims,
                                preferred_element_type=jnp.float32)
        s = s * scale + bias
        s = s - jnp.max(s, axis=-1, keepdims=True)
        p = jnp.exp(s)
        p = p * pl.reciprocal(jnp.sum(p, axis=-1, keepdims=True), approx=True)
        ctx_parts.append(
            jnp.dot(p.astype(jnp.bfloat16), vb[:, lo:hi],
                    preferred_element_type=jnp.float32))        # (R, dh)

    # concat_h(ctx_h) @ Wo : one K=D lane-dense matmul against the un-split Wo.
    ctx = jnp.concatenate(ctx_parts, axis=-1).astype(jnp.bfloat16)  # (R, D)
    attn = jnp.dot(ctx, wo_ref[0],
                   preferred_element_type=jnp.float32) + bo_ref[0]

    # ---- post-LN residual + ReLU FFN (f32 LN stats, bf16 MXU operands) ------
    h1 = _layer_norm(x + attn, g1_ref[0], be1_ref[0])
    ff = jnp.maximum(
        jnp.dot(h1.astype(jnp.bfloat16), w1_ref[0],
                preferred_element_type=jnp.float32) + bf1_ref[0], 0.0)
    ff = jnp.dot(ff.astype(jnp.bfloat16), w2_ref[0],
                 preferred_element_type=jnp.float32) + bf2_ref[0]
    x_new = _layer_norm(h1 + ff, g2_ref[0], be2_ref[0])
    x_scr[...] = x_new

    # ---- last layer step: prediction head, lane-dense (1, R) output ---------
    @pl.when(l == pl.num_programs(1) - 1)
    def _():
        logits = jax.lax.dot_general(
            wp_ref[...], x_new.astype(jnp.bfloat16), dims,
            preferred_element_type=jnp.float32) + bp_ref[...]   # (1, R)
        out_ref[0] = jax.nn.sigmoid(logits)


# ----------------------------------------------------------------------------
# Host-side preparation + pallas_call wrapper
# ----------------------------------------------------------------------------
def _pick_batch_tile(B, Sp, target_rows=128):
    """Batch-tiling policy:
    - long sequences (Sp >= target_rows): Bt=1, no block-diagonal waste;
    - short sequences: smallest divisor of B whose rows fill ~target_rows.
    (Tune target_rows up to 256-512 on v5e/v6e; keep nt >= 2 on v7x so both
    TensorCores are used.)"""
    if Sp >= target_rows:
        return 1
    bt = 1
    for cand in range(1, B + 1):
        if B % cand == 0:
            bt = cand
            if cand * Sp >= target_rows:
                break
    return bt


def transformer_forward(params, cat_idx, num_feat, mask, *, num_heads):
    """Pallas forward matching Transformer.forward (eval mode, dropout = id)."""
    D = params["dim_model"]
    L = len(params["layers"])
    H = num_heads
    assert D % H == 0

    # --- embedding gather (padding_idx=0 -> zero row): plain-JAX glue --------
    emb = jnp.take(params["emb_cat"], cat_idx, axis=0)          # (B, S, n_cat, E)
    B, S, n_cat, E = emb.shape
    Ecat = n_cat * E
    Nnum = num_feat.shape[-1]
    Ein = Ecat + Nnum
    feat = jnp.concatenate(
        [emb.reshape(B, S, Ecat).astype(jnp.float32),
         num_feat.astype(jnp.float32)], axis=-1)                # (B, S, Ein)
    mask_f = mask.astype(jnp.float32)

    # --- pad seq axis to a sublane multiple so row-major tiling stays aligned
    Sp = ((S + 7) // 8) * 8
    if Sp != S:
        feat = jnp.pad(feat, ((0, 0), (0, Sp - S), (0, 0)))
        mask_f = jnp.pad(mask_f, ((0, 0), (0, Sp - S)))         # pads = masked keys

    Bt = _pick_batch_tile(B, Sp)
    nt = B // Bt
    R = Bt * Sp

    x_rows = feat.reshape(B * Sp, Ein).astype(jnp.bfloat16)     # (B*Sp, Ein)

    # --- tiny batch-id codes replacing the old (nt, R, R) f32 bias input -----
    bid = (jnp.arange(R, dtype=jnp.int32) // Sp).astype(jnp.float32)
    qid = bid.reshape(R, 1)                                     # (R, 1) per-row id
    key_valid = mask_f.reshape(nt, R) > 0.5
    kcode = jnp.where(key_valid, bid[None, :], -1.0).reshape(nt, 1, R)

    # --- fuse the two half-width input projections into one (Ein, D) weight --
    half = D // 2
    w_in = jnp.zeros((Ein, D), jnp.float32)
    w_in = w_in.at[:Ecat, :half].set(params["wc"])
    w_in = w_in.at[Ecat:, half:].set(params["wn"])
    w_in = w_in.astype(jnp.bfloat16)
    b_in = jnp.concatenate([params["bc"], params["bn"]], axis=-1)   # (1, D) f32

    # --- stacked per-layer params: weights bf16, biases / LN params f32 ------
    def stack(name, dtype):
        return jnp.stack([lp[name] for lp in params["layers"]], 0).astype(dtype)

    layer_arrays = [
        stack("wq", jnp.bfloat16), stack("bq", jnp.float32),
        stack("wk", jnp.bfloat16), stack("bk", jnp.float32),
        stack("wv", jnp.bfloat16), stack("bv", jnp.float32),
        stack("wo", jnp.bfloat16), stack("bo", jnp.float32),
        stack("g1", jnp.float32), stack("be1", jnp.float32),
        stack("w1", jnp.bfloat16), stack("bf1", jnp.float32),
        stack("w2", jnp.bfloat16), stack("bf2", jnp.float32),
        stack("g2", jnp.float32), stack("be2", jnp.float32),
    ]

    wp_row = params["w_pred"].T.astype(jnp.bfloat16)            # (1, D)
    bp = params["b_pred"]                                       # (1, 1) f32

    def const_spec(arr):
        nd = arr.ndim
        return pl.BlockSpec(arr.shape, lambda t, l, nd=nd: (0,) * nd)

    def layer_spec(arr):
        nd = arr.ndim
        return pl.BlockSpec((1,) + arr.shape[1:],
                            lambda t, l, nd=nd: (l,) + (0,) * (nd - 1))

    in_specs = [
        pl.BlockSpec((R, Ein), lambda t, l: (t, 0)),            # activations in
        const_spec(qid),
        pl.BlockSpec((1, 1, R), lambda t, l: (t, 0, 0)),        # key codes
        const_spec(w_in), const_spec(b_in),
        *[layer_spec(a) for a in layer_arrays],                 # streamed per layer
        const_spec(wp_row), const_spec(bp),
    ]

    out = pl.pallas_call(
        partial(fused_transformer_kernel, num_heads=H),
        out_shape=jax.ShapeDtypeStruct((nt, 1, R), jnp.float32),
        grid=(nt, L),                                           # layer axis inner
        in_specs=in_specs,
        out_specs=pl.BlockSpec((1, 1, R), lambda t, l: (t, 0, 0)),
        scratch_shapes=[pltpu.VMEM((R, D), jnp.float32)],       # x carried across layers
        compiler_params=pltpu.CompilerParams(
            dimension_semantics=("parallel", "arbitrary")),
    )(x_rows, qid, kcode, w_in, b_in, *layer_arrays, wp_row, bp)

    # Rows within a tile are ordered (local_batch, seq) => global (batch, seq).
    return out.reshape(B, Sp)[:, :S]


# ----------------------------------------------------------------------------
# Pure-JAX reference (for correctness checking only)
# ----------------------------------------------------------------------------
def transformer_forward_reference(params, cat_idx, num_feat, mask, *, num_heads):
    emb = jnp.take(params["emb_cat"], cat_idx, axis=0)
    B, S, n_cat, E = emb.shape
    cat_flat = emb.reshape(B, S, n_cat * E)
    D = params["dim_model"]
    H = num_heads
    dh = D // H
    x = jnp.concatenate(
        [cat_flat @ params["wc"] + params["bc"],
         num_feat @ params["wn"] + params["bn"]], axis=-1)       # (B, S, D)
    key_bias = (1.0 - mask.astype(jnp.float32))[:, None, None, :] * NEG_INF
    for lp in params["layers"]:
        q = (x @ lp["wq"] + lp["bq"]).reshape(B, S, H, dh).transpose(0, 2, 1, 3)
        k = (x @ lp["wk"] + lp["bk"]).reshape(B, S, H, dh).transpose(0, 2, 1, 3)
        v = (x @ lp["wv"] + lp["bv"]).reshape(B, S, H, dh).transpose(0, 2, 1, 3)
        s = jnp.einsum("bhqe,bhke->bhqk", q, k) / math.sqrt(dh) + key_bias
        p = jax.nn.softmax(s, axis=-1)
        ctx = jnp.einsum("bhqk,bhke->bhqe", p, v)
        ctx = ctx.transpose(0, 2, 1, 3).reshape(B, S, D)
        attn = ctx @ lp["wo"] + lp["bo"]
        h1 = _layer_norm(x + attn, lp["g1"], lp["be1"])
        ff = jnp.maximum(h1 @ lp["w1"] + lp["bf1"], 0.0)
        ff = ff @ lp["w2"] + lp["bf2"]
        x = _layer_norm(h1 + ff, lp["g2"], lp["be2"])
    logits = x @ params["w_pred"] + params["b_pred"]
    return jax.nn.sigmoid(logits)[..., 0]


# ----------------------------------------------------------------------------
# Parameter initialization (mirrors the module's __init__ shapes)
# ----------------------------------------------------------------------------
def init_params(key, *, dim_model, dim_ffn, num_heads, n_layers,
                embedding_dim, n_cat, n_num, offset):
    del num_heads
    ks = iter(jax.random.split(key, 8 + 20 * n_layers))

    def w(shape, scale=0.05):
        return jax.random.normal(next(ks), shape, jnp.float32) * scale

    emb = w((offset + 1, embedding_dim), 0.1)
    emb = emb.at[0].set(0.0)                 # padding_idx = 0
    half = dim_model // 2

    layers = []
    for _ in range(n_layers):
        layers.append(dict(
            wq=w((dim_model, dim_model)), bq=jnp.zeros((1, dim_model), jnp.float32),
            wk=w((dim_model, dim_model)), bk=jnp.zeros((1, dim_model), jnp.float32),
            wv=w((dim_model, dim_model)), bv=jnp.zeros((1, dim_model), jnp.float32),
            wo=w((dim_model, dim_model)), bo=jnp.zeros((1, dim_model), jnp.float32),
            g1=jnp.ones((1, dim_model), jnp.float32), be1=jnp.zeros((1, dim_model), jnp.float32),
            w1=w((dim_model, dim_ffn)), bf1=jnp.zeros((1, dim_ffn), jnp.float32),
            w2=w((dim_ffn, dim_model)), bf2=jnp.zeros((1, dim_model), jnp.float32),
            g2=jnp.ones((1, dim_model), jnp.float32), be2=jnp.zeros((1, dim_model), jnp.float32),
        ))

    return dict(
        dim_model=dim_model,
        emb_cat=emb,
        wc=w((embedding_dim * n_cat, half)), bc=jnp.zeros((1, half), jnp.float32),
        wn=w((n_num, half)), bn=jnp.zeros((1, half), jnp.float32),
        layers=layers,
        w_pred=w((dim_model, 1)), b_pred=jnp.zeros((1, 1), jnp.float32),
    )


if __name__ == "__main__":
    # Small config consistent with the module's __init__.
    B, S = 2, 8
    dim_model, dim_ffn, num_heads, n_layers = 32, 64, 4, 2
    embedding_dim, n_cat, n_num, offset = 8, 3, 2, 20

    key = jax.random.PRNGKey(0)
    k_par, k_cat, k_num = jax.random.split(key, 3)

    params = init_params(k_par, dim_model=dim_model, dim_ffn=dim_ffn,
                         num_heads=num_heads, n_layers=n_layers,
                         embedding_dim=embedding_dim, n_cat=n_cat,
                         n_num=n_num, offset=offset)

    # X dict contents: categorical id tensor, numerical features, padding mask.
    cat_idx = jax.random.randint(k_cat, (B, S, n_cat), 1, offset + 1, jnp.int32)
    num_feat = jax.random.normal(k_num, (B, S, n_num), jnp.float32)
    mask = jnp.ones((B, S), jnp.float32).at[1, 6:].set(0.0)   # batch 1: last 2 padded
    cat_idx = cat_idx.at[1, 6:].set(0)                        # padded ids -> 0

    out = transformer_forward(params, cat_idx, num_feat, mask, num_heads=num_heads)
    jax.block_until_ready(out)

    assert out.shape == (B, S), out.shape
    assert bool(jnp.all(jnp.isfinite(out)))
    assert bool(jnp.all((out >= 0.0) & (out <= 1.0)))         # sigmoid output

    ref = transformer_forward_reference(params, cat_idx, num_feat, mask,
                                        num_heads=num_heads)
    err = float(jnp.max(jnp.abs(out - ref)))
    assert err < 2e-2, f"max |pallas - reference| = {err}"    # bf16-MXU tolerance
    print("KERNEL_OK")
</pallas_src>

<mosaic_0001>
module attributes {stable_mosaic.version = 11 : i64} {
  func.func @fused_transformer_kernel(%arg0: i32, %arg1: i32, %arg2: memref<16x26xbf16, #tpu.memory_space<vmem>>, %arg3: memref<16x1xf32, #tpu.memory_space<vmem>>, %arg4: memref<1x1x16xf32, #tpu.memory_space<vmem>>, %arg5: memref<26x32xbf16, #tpu.memory_space<vmem>>, %arg6: memref<1x32xf32, #tpu.memory_space<vmem>>, %arg7: memref<1x32x32xbf16, #tpu.memory_space<vmem>>, %arg8: memref<1x1x32xf32, #tpu.memory_space<vmem>>, %arg9: memref<1x32x32xbf16, #tpu.memory_space<vmem>>, %arg10: memref<1x1x32xf32, #tpu.memory_space<vmem>>, %arg11: memref<1x32x32xbf16, #tpu.memory_space<vmem>>, %arg12: memref<1x1x32xf32, #tpu.memory_space<vmem>>, %arg13: memref<1x32x32xbf16, #tpu.memory_space<vmem>>, %arg14: memref<1x1x32xf32, #tpu.memory_space<vmem>>, %arg15: memref<1x1x32xf32, #tpu.memory_space<vmem>>, %arg16: memref<1x1x32xf32, #tpu.memory_space<vmem>>, %arg17: memref<1x32x64xbf16, #tpu.memory_space<vmem>>, %arg18: memref<1x1x64xf32, #tpu.memory_space<vmem>>, %arg19: memref<1x64x32xbf16, #tpu.memory_space<vmem>>, %arg20: memref<1x1x32xf32, #tpu.memory_space<vmem>>, %arg21: memref<1x1x32xf32, #tpu.memory_space<vmem>>, %arg22: memref<1x1x32xf32, #tpu.memory_space<vmem>>, %arg23: memref<1x32xbf16, #tpu.memory_space<vmem>>, %arg24: memref<1x1xf32, #tpu.memory_space<vmem>>, %arg25: memref<1x1x16xf32, #tpu.memory_space<vmem>>, %arg26: memref<16x32xf32, #tpu.memory_space<vmem>>) attributes {dimension_semantics = [#tpu.dimension_semantics<parallel>, #tpu.dimension_semantics<arbitrary>], iteration_bounds = array<i64: 1, 2>, scalar_prefetch = 0 : i64, scratch_operands = 1 : i64, tpu.core_type = #tpu.core_type<tc>, window_params = [{transform_indices = @transform_0, window_bounds = array<i64: 16, 26>}, {pipeline_mode = #tpu.pipeline_mode<synchronous>, transform_indices = @transform_1, window_bounds = array<i64: 16, 1>}, {transform_indices = @transform_2, window_bounds = array<i64: 1, 1, 16>}, {pipeline_mode = #tpu.pipeline_mode<synchronous>, transform_indices = @transform_3, window_bounds = array<i64: 26, 32>}, {pipeline_mode = #tpu.pipeline_mode<synchronous>, transform_indices = @transform_4, window_bounds = array<i64: 1, 32>}, {transform_indices = @transform_5, window_bounds = array<i64: 1, 32, 32>}, {transform_indices = @transform_6, window_bounds = array<i64: 1, 1, 32>}, {transform_indices = @transform_7, window_bounds = array<i64: 1, 32, 32>}, {transform_indices = @transform_8, window_bounds = array<i64: 1, 1, 32>}, {transform_indices = @transform_9, window_bounds = array<i64: 1, 32, 32>}, {transform_indices = @transform_10, window_bounds = array<i64: 1, 1, 32>}, {transform_indices = @transform_11, window_bounds = array<i64: 1, 32, 32>}, {transform_indices = @transform_12, window_bounds = array<i64: 1, 1, 32>}, {transform_indices = @transform_13, window_bounds = array<i64: 1, 1, 32>}, {transform_indices = @transform_14, window_bounds = array<i64: 1, 1, 32>}, {transform_indices = @transform_15, window_bounds = array<i64: 1, 32, 64>}, {transform_indices = @transform_16, window_bounds = array<i64: 1, 1, 64>}, {transform_indices = @transform_17, window_bounds = array<i64: 1, 64, 32>}, {transform_indices = @transform_18, window_bounds = array<i64: 1, 1, 32>}, {transform_indices = @transform_19, window_bounds = array<i64: 1, 1, 32>}, {transform_indices = @transform_20, window_bounds = array<i64: 1, 1, 32>}, {pipeline_mode = #tpu.pipeline_mode<synchronous>, transform_indices = @transform_21, window_bounds = array<i64: 1, 32>}, {pipeline_mode = #tpu.pipeline_mode<synchronous>, transform_indices = @transform_22, window_bounds = array<i64: 1, 1>}, {transform_indices = @transform_23, window_bounds = array<i64: 1, 1, 16>}]} {
    %c0_i32 = arith.constant 0 : i32
    %0 = arith.cmpi eq, %arg1, %c0_i32 : i32
    %1 = arith.extui %0 : i1 to i32
    %c0_i32_0 = arith.constant 0 : i32
    %2 = arith.cmpi ne, %1, %c0_i32_0 : i32
    scf.if %2 {
      %c0_96 = arith.constant 0 : index
      %c0_97 = arith.constant 0 : index
      %199 = vector.load %arg2[%c0_96, %c0_97] : memref<16x26xbf16, #tpu.memory_space<vmem>>, vector<16x26xbf16>
      %c0_98 = arith.constant 0 : index
      %c0_99 = arith.constant 0 : index
      %200 = vector.load %arg5[%c0_98, %c0_99] : memref<26x32xbf16, #tpu.memory_space<vmem>>, vector<26x32xbf16>
      %cst_100 = arith.constant dense<0.000000e+00> : vector<16x32xf32>
      %201 = tpu.matmul %199, %200, %cst_100 {dimension_numbers = #tpu.dot_dimension_numbers<[1], [0], [0], [1], [0, 0, 1, 1], [], []>} : vector<16x26xbf16>, vector<26x32xbf16>, vector<16x32xf32> -> vector<16x32xf32>
      %c0_101 = arith.constant 0 : index
      %c0_102 = arith.constant 0 : index
      %202 = vector.load %arg6[%c0_101, %c0_102] : memref<1x32xf32, #tpu.memory_space<vmem>>, vector<1x32xf32>
      %203 = vector.broadcast %202 : vector<1x32xf32> to vector<16x32xf32>
      %204 = arith.addf %201, %203 : vector<16x32xf32>
      %c0_103 = arith.constant 0 : index
      %c0_104 = arith.constant 0 : index
      %205 = vector.load %arg26[%c0_103, %c0_104] : memref<16x32xf32, #tpu.memory_space<vmem>>, vector<16x32xf32>
      tpu.vector_store %arg26[%c0_103, %c0_104], %204 {strides = array<i32>} : memref<16x32xf32, #tpu.memory_space<vmem>>, vector<16x32xf32>,
    } else {
    }
    %c0 = arith.constant 0 : index
    %c0_1 = arith.constant 0 : index
    %3 = vector.load %arg26[%c0, %c0_1] : memref<16x32xf32, #tpu.memory_space<vmem>>, vector<16x32xf32>
    %c0_2 = arith.constant 0 : index
    %c0_3 = arith.constant 0 : index
    %4 = vector.load %arg3[%c0_2, %c0_3] : memref<16x1xf32, #tpu.memory_space<vmem>>, vector<16x1xf32>
    %c0_4 = arith.constant 0 : index
    %c0_5 = arith.constant 0 : index
    %c0_6 = arith.constant 0 : index
    %5 = vector.load %arg4[%c0_4, %c0_5, %c0_6] : memref<1x1x16xf32, #tpu.memory_space<vmem>>, vector<1x1x16xf32>
    %6 = vector.shape_cast %5 : vector<1x1x16xf32> to vector<1x16xf32>
    %7 = vector.broadcast %4 : vector<16x1xf32> to vector<16x16xf32>
    %8 = vector.broadcast %6 : vector<1x16xf32> to vector<16x16xf32>
    %9 = arith.cmpf oeq, %7, %8 : vector<16x16xf32>
    %cst = arith.constant 0.000000e+00 : f32
    %cst_7 = arith.constant -1.000000e+09 : f32
    %10 = vector.broadcast %cst : f32 to vector<16x16xf32>
    %11 = vector.broadcast %cst_7 : f32 to vector<16x16xf32>
    %12 = arith.select %9, %10, %11 : vector<16x16xi1>, vector<16x16xf32>
    %13 = arith.truncf %3 : vector<16x32xf32> to vector<16x32xbf16>
    %c0_8 = arith.constant 0 : index
    %c0_9 = arith.constant 0 : index
    %c0_10 = arith.constant 0 : index
    %14 = vector.load %arg7[%c0_8, %c0_9, %c0_10] : memref<1x32x32xbf16, #tpu.memory_space<vmem>>, vector<1x32x32xbf16>
    %15 = vector.shape_cast %14 : vector<1x32x32xbf16> to vector<32x32xbf16>
    %cst_11 = arith.constant dense<0.000000e+00> : vector<16x32xf32>
    %16 = tpu.matmul %13, %15, %cst_11 {dimension_numbers = #tpu.dot_dimension_numbers<[1], [0], [0], [1], [0, 0, 1, 1], [], []>} : vector<16x32xbf16>, vector<32x32xbf16>, vector<16x32xf32> -> vector<16x32xf32>
    %c0_12 = arith.constant 0 : index
    %c0_13 = arith.constant 0 : index
    %c0_14 = arith.constant 0 : index
    %17 = vector.load %arg8[%c0_12, %c0_13, %c0_14] : memref<1x1x32xf32, #tpu.memory_space<vmem>>, vector<1x1x32xf32>
    %18 = vector.shape_cast %17 : vector<1x1x32xf32> to vector<1x32xf32>
    %19 = vector.broadcast %18 : vector<1x32xf32> to vector<16x32xf32>
    %20 = arith.addf %16, %19 : vector<16x32xf32>
    %c0_15 = arith.constant 0 : index
    %c0_16 = arith.constant 0 : index
    %c0_17 = arith.constant 0 : index
    %21 = vector.load %arg9[%c0_15, %c0_16, %c0_17] : memref<1x32x32xbf16, #tpu.memory_space<vmem>>, vector<1x32x32xbf16>
    %22 = vector.shape_cast %21 : vector<1x32x32xbf16> to vector<32x32xbf16>
    %cst_18 = arith.constant dense<0.000000e+00> : vector<16x32xf32>
    %23 = tpu.matmul %13, %22, %cst_18 {dimension_numbers = #tpu.dot_dimension_numbers<[1], [0], [0], [1], [0, 0, 1, 1], [], []>} : vector<16x32xbf16>, vector<32x32xbf16>, vector<16x32xf32> -> vector<16x32xf32>
    %c0_19 = arith.constant 0 : index
    %c0_20 = arith.constant 0 : index
    %c0_21 = arith.constant 0 : index
    %24 = vector.load %arg10[%c0_19, %c0_20, %c0_21] : memref<1x1x32xf32, #tpu.memory_space<vmem>>, vector<1x1x32xf32>
    %25 = vector.shape_cast %24 : vector<1x1x32xf32> to vector<1x32xf32>
    %26 = vector.broadcast %25 : vector<1x32xf32> to vector<16x32xf32>
    %27 = arith.addf %23, %26 : vector<16x32xf32>
    %c0_22 = arith.constant 0 : index
    %c0_23 = arith.constant 0 : index
    %c0_24 = arith.constant 0 : index
    %28 = vector.load %arg11[%c0_22, %c0_23, %c0_24] : memref<1x32x32xbf16, #tpu.memory_space<vmem>>, vector<1x32x32xbf16>
    %29 = vector.shape_cast %28 : vector<1x32x32xbf16> to vector<32x32xbf16>
    %cst_25 = arith.constant dense<0.000000e+00> : vector<16x32xf32>
    %30 = tpu.matmul %13, %29, %cst_25 {dimension_numbers = #tpu.dot_dimension_numbers<[1], [0], [0], [1], [0, 0, 1, 1], [], []>} : vector<16x32xbf16>, vector<32x32xbf16>, vector<16x32xf32> -> vector<16x32xf32>
    %c0_26 = arith.constant 0 : index
    %c0_27 = arith.constant 0 : index
    %c0_28 = arith.constant 0 : index
    %31 = vector.load %arg12[%c0_26, %c0_27, %c0_28] : memref<1x1x32xf32, #tpu.memory_space<vmem>>, vector<1x1x32xf32>
    %32 = vector.shape_cast %31 : vector<1x1x32xf32> to vector<1x32xf32>
    %33 = vector.broadcast %32 : vector<1x32xf32> to vector<16x32xf32>
    %34 = arith.addf %30, %33 : vector<16x32xf32>
    %35 = arith.truncf %20 : vector<16x32xf32> to vector<16x32xbf16>
    %36 = arith.truncf %27 : vector<16x32xf32> to vector<16x32xbf16>
    %37 = arith.truncf %34 : vector<16x32xf32> to vector<16x32xbf16>
    %38 = vector.extract_strided_slice %35 {offsets = [0, 0], sizes = [16, 8], strides = [1, 1]} : vector<16x32xbf16> to vector<16x8xbf16>
    %39 = vector.extract_strided_slice %36 {offsets = [0, 0], sizes = [16, 8], strides = [1, 1]} : vector<16x32xbf16> to vector<16x8xbf16>
    %cst_29 = arith.constant dense<0.000000e+00> : vector<16x16xf32>
    %40 = tpu.matmul %38, %39, %cst_29 {dimension_numbers = #tpu.dot_dimension_numbers<[1], [1], [0], [0], [0, 0, 1, 0], [], []>} : vector<16x8xbf16>, vector<16x8xbf16>, vector<16x16xf32> -> vector<16x16xf32>
    %cst_30 = arith.constant 0.353553385 : f32
    %41 = vector.broadcast %cst_30 : f32 to vector<16x16xf32>
    %42 = arith.mulf %40, %41 : vector<16x16xf32>
    %43 = arith.addf %42, %12 : vector<16x16xf32>
    %cst_31 = arith.constant dense<0xFF800000> : vector<16xf32>
    %44 = vector.multi_reduction <maximumf>, %43, %cst_31 [1] : vector<16x16xf32> to vector<16xf32>
    %45 = vector.shape_cast %44 : vector<16xf32> to vector<16x1xf32>
    %46 = vector.broadcast %45 : vector<16x1xf32> to vector<16x16xf32>
    %47 = arith.subf %43, %46 : vector<16x16xf32>
    %48 = math.exp %47 : vector<16x16xf32>
    %cst_32 = arith.constant dense<0.000000e+00> : vector<16xf32>
    %49 = vector.multi_reduction <add>, %48, %cst_32 [1] : vector<16x16xf32> to vector<16xf32>
    %50 = vector.shape_cast %49 : vector<16xf32> to vector<16x1xf32>
    %51 = tpu.reciprocal %50 {approx = true} : vector<16x1xf32> -> vector<16x1xf32>
    %52 = vector.broadcast %51 : vector<16x1xf32> to vector<16x16xf32>
    %53 = arith.mulf %48, %52 : vector<16x16xf32>
    %54 = arith.truncf %53 : vector<16x16xf32> to vector<16x16xbf16>
    %55 = vector.extract_strided_slice %37 {offsets = [0, 0], sizes = [16, 8], strides = [1, 1]} : vector<16x32xbf16> to vector<16x8xbf16>
    %cst_33 = arith.constant dense<0.000000e+00> : vector<16x8xf32>
    %56 = tpu.matmul %54, %55, %cst_33 {dimension_numbers = #tpu.dot_dimension_numbers<[1], [0], [0], [1], [0, 0, 1, 1], [], []>} : vector<16x16xbf16>, vector<16x8xbf16>, vector<16x8xf32> -> vector<16x8xf32>
    %57 = vector.extract_strided_slice %35 {offsets = [0, 8], sizes = [16, 8], strides = [1, 1]} : vector<16x32xbf16> to vector<16x8xbf16>
    %58 = vector.extract_strided_slice %36 {offsets = [0, 8], sizes = [16, 8], strides = [1, 1]} : vector<16x32xbf16> to vector<16x8xbf16>
    %cst_34 = arith.constant dense<0.000000e+00> : vector<16x16xf32>
    %59 = tpu.matmul %57, %58, %cst_34 {dimension_numbers = #tpu.dot_dimension_numbers<[1], [1], [0], [0], [0, 0, 1, 0], [], []>} : vector<16x8xbf16>, vector<16x8xbf16>, vector<16x16xf32> -> vector<16x16xf32>
    %cst_35 = arith.constant 0.353553385 : f32
    %60 = vector.broadcast %cst_35 : f32 to vector<16x16xf32>
    %61 = arith.mulf %59, %60 : vector<16x16xf32>
    %62 = arith.addf %61, %12 : vector<16x16xf32>
    %cst_36 = arith.constant dense<0xFF800000> : vector<16xf32>
    %63 = vector.multi_reduction <maximumf>, %62, %cst_36 [1] : vector<16x16xf32> to vector<16xf32>
    %64 = vector.shape_cast %63 : vector<16xf32> to vector<16x1xf32>
    %65 = vector.broadcast %64 : vector<16x1xf32> to vector<16x16xf32>
    %66 = arith.subf %62, %65 : vector<16x16xf32>
    %67 = math.exp %66 : vector<16x16xf32>
    %cst_37 = arith.constant dense<0.000000e+00> : vector<16xf32>
    %68 = vector.multi_reduction <add>, %67, %cst_37 [1] : vector<16x16xf32> to vector<16xf32>
    %69 = vector.shape_cast %68 : vector<16xf32> to vector<16x1xf32>
    %70 = tpu.reciprocal %69 {approx = true} : vector<16x1xf32> -> vector<16x1xf32>
    %71 = vector.broadcast %70 : vector<16x1xf32> to vector<16x16xf32>
    %72 = arith.mulf %67, %71 : vector<16x16xf32>
    %73 = arith.truncf %72 : vector<16x16xf32> to vector<16x16xbf16>
    %74 = vector.extract_strided_slice %37 {offsets = [0, 8], sizes = [16, 8], strides = [1, 1]} : vector<16x32xbf16> to vector<16x8xbf16>
    %cst_38 = arith.constant dense<0.000000e+00> : vector<16x8xf32>
    %75 = tpu.matmul %73, %74, %cst_38 {dimension_numbers = #tpu.dot_dimension_numbers<[1], [0], [0], [1], [0, 0, 1, 1], [], []>} : vector<16x16xbf16>, vector<16x8xbf16>, vector<16x8xf32> -> vector<16x8xf32>
    %76 = vector.extract_strided_slice %35 {offsets = [0, 16], sizes = [16, 8], strides = [1, 1]} : vector<16x32xbf16> to vector<16x8xbf16>
    %77 = vector.extract_strided_slice %36 {offsets = [0, 16], sizes = [16, 8], strides = [1, 1]} : vector<16x32xbf16> to vector<16x8xbf16>
    %cst_39 = arith.constant dense<0.000000e+00> : vector<16x16xf32>
    %78 = tpu.matmul %76, %77, %cst_39 {dimension_numbers = #tpu.dot_dimension_numbers<[1], [1], [0], [0], [0, 0, 1, 0], [], []>} : vector<16x8xbf16>, vector<16x8xbf16>, vector<16x16xf32> -> vector<16x16xf32>
    %cst_40 = arith.constant 0.353553385 : f32
    %79 = vector.broadcast %cst_40 : f32 to vector<16x16xf32>
    %80 = arith.mulf %78, %79 : vector<16x16xf32>
    %81 = arith.addf %80, %12 : vector<16x16xf32>
    %cst_41 = arith.constant dense<0xFF800000> : vector<16xf32>
    %82 = vector.multi_reduction <maximumf>, %81, %cst_41 [1] : vector<16x16xf32> to vector<16xf32>
    %83 = vector.shape_cast %82 : vector<16xf32> to vector<16x1xf32>
    %84 = vector.broadcast %83 : vector<16x1xf32> to vector<16x16xf32>
    %85 = arith.subf %81, %84 : vector<16x16xf32>
    %86 = math.exp %85 : vector<16x16xf32>
    %cst_42 = arith.constant dense<0.000000e+00> : vector<16xf32>
    %87 = vector.multi_reduction <add>, %86, %cst_42 [1] : vector<16x16xf32> to vector<16xf32>
    %88 = vector.shape_cast %87 : vector<16xf32> to vector<16x1xf32>
    %89 = tpu.reciprocal %88 {approx = true} : vector<16x1xf32> -> vector<16x1xf32>
    %90 = vector.broadcast %89 : vector<16x1xf32> to vector<16x16xf32>
    %91 = arith.mulf %86, %90 : vector<16x16xf32>
    %92 = arith.truncf %91 : vector<16x16xf32> to vector<16x16xbf16>
    %93 = vector.extract_strided_slice %37 {offsets = [0, 16], sizes = [16, 8], strides = [1, 1]} : vector<16x32xbf16> to vector<16x8xbf16>
    %cst_43 = arith.constant dense<0.000000e+00> : vector<16x8xf32>
    %94 = tpu.matmul %92, %93, %cst_43 {dimension_numbers = #tpu.dot_dimension_numbers<[1], [0], [0], [1], [0, 0, 1, 1], [], []>} : vector<16x16xbf16>, vector<16x8xbf16>, vector<16x8xf32> -> vector<16x8xf32>
    %95 = vector.extract_strided_slice %35 {offsets = [0, 24], sizes = [16, 8], strides = [1, 1]} : vector<16x32xbf16> to vector<16x8xbf16>
    %96 = vector.extract_strided_slice %36 {offsets = [0, 24], sizes = [16, 8], strides = [1, 1]} : vector<16x32xbf16> to vector<16x8xbf16>
    %cst_44 = arith.constant dense<0.000000e+00> : vector<16x16xf32>
    %97 = tpu.matmul %95, %96, %cst_44 {dimension_numbers = #tpu.dot_dimension_numbers<[1], [1], [0], [0], [0, 0, 1, 0], [], []>} : vector<16x8xbf16>, vector<16x8xbf16>, vector<16x16xf32> -> vector<16x16xf32>
    %cst_45 = arith.constant 0.353553385 : f32
    %98 = vector.broadcast %cst_45 : f32 to vector<16x16xf32>
    %99 = arith.mulf %97, %98 : vector<16x16xf32>
    %100 = arith.addf %99, %12 : vector<16x16xf32>
    %cst_46 = arith.constant dense<0xFF800000> : vector<16xf32>
    %101 = vector.multi_reduction <maximumf>, %100, %cst_46 [1] : vector<16x16xf32> to vector<16xf32>
    %102 = vector.shape_cast %101 : vector<16xf32> to vector<16x1xf32>
    %103 = vector.broadcast %102 : vector<16x1xf32> to vector<16x16xf32>
    %104 = arith.subf %100, %103 : vector<16x16xf32>
    %105 = math.exp %104 : vector<16x16xf32>
    %cst_47 = arith.constant dense<0.000000e+00> : vector<16xf32>
    %106 = vector.multi_reduction <add>, %105, %cst_47 [1] : vector<16x16xf32> to vector<16xf32>
    %107 = vector.shape_cast %106 : vector<16xf32> to vector<16x1xf32>
    %108 = tpu.reciprocal %107 {approx = true} : vector<16x1xf32> -> vector<16x1xf32>
    %109 = vector.broadcast %108 : vector<16x1xf32> to vector<16x16xf32>
    %110 = arith.mulf %105, %109 : vector<16x16xf32>
    %111 = arith.truncf %110 : vector<16x16xf32> to vector<16x16xbf16>
    %112 = vector.extract_strided_slice %37 {offsets = [0, 24], sizes = [16, 8], strides = [1, 1]} : vector<16x32xbf16> to vector<16x8xbf16>
    %cst_48 = arith.constant dense<0.000000e+00> : vector<16x8xf32>
    %113 = tpu.matmul %111, %112, %cst_48 {dimension_numbers = #tpu.dot_dimension_numbers<[1], [0], [0], [1], [0, 0, 1, 1], [], []>} : vector<16x16xbf16>, vector<16x8xbf16>, vector<16x8xf32> -> vector<16x8xf32>
    %114 = tpu.concatenate %56, %75, %94, %113 in 1 : vector<16x8xf32>, vector<16x8xf32>, vector<16x8xf32>, vector<16x8xf32> -> vector<16x32xf32>
    %115 = arith.truncf %114 : vector<16x32xf32> to vector<16x32xbf16>
    %c0_49 = arith.constant 0 : index
    %c0_50 = arith.constant 0 : index
    %c0_51 = arith.constant 0 : index
    %116 = vector.load %arg13[%c0_49, %c0_50, %c0_51] : memref<1x32x32xbf16, #tpu.memory_space<vmem>>, vector<1x32x32xbf16>
    %117 = vector.shape_cast %116 : vector<1x32x32xbf16> to vector<32x32xbf16>
    %cst_52 = arith.constant dense<0.000000e+00> : vector<16x32xf32>
    %118 = tpu.matmul %115, %117, %cst_52 {dimension_numbers = #tpu.dot_dimension_numbers<[1], [0], [0], [1], [0, 0, 1, 1], [], []>} : vector<16x32xbf16>, vector<32x32xbf16>, vector<16x32xf32> -> vector<16x32xf32>
    %c0_53 = arith.constant 0 : index
    %c0_54 = arith.constant 0 : index
    %c0_55 = arith.constant 0 : index
    %119 = vector.load %arg14[%c0_53, %c0_54, %c0_55] : memref<1x1x32xf32, #tpu.memory_space<vmem>>, vector<1x1x32xf32>
    %120 = vector.shape_cast %119 : vector<1x1x32xf32> to vector<1x32xf32>
    %121 = vector.broadcast %120 : vector<1x32xf32> to vector<16x32xf32>
    %122 = arith.addf %118, %121 : vector<16x32xf32>
    %123 = arith.addf %3, %122 : vector<16x32xf32>
    %c0_56 = arith.constant 0 : index
    %c0_57 = arith.constant 0 : index
    %c0_58 = arith.constant 0 : index
    %124 = vector.load %arg15[%c0_56, %c0_57, %c0_58] : memref<1x1x32xf32, #tpu.memory_space<vmem>>, vector<1x1x32xf32>
    %125 = vector.shape_cast %124 : vector<1x1x32xf32> to vector<1x32xf32>
    %c0_59 = arith.constant 0 : index
    %c0_60 = arith.constant 0 : index
    %c0_61 = arith.constant 0 : index
    %126 = vector.load %arg16[%c0_59, %c0_60, %c0_61] : memref<1x1x32xf32, #tpu.memory_space<vmem>>, vector<1x1x32xf32>
    %127 = vector.shape_cast %126 : vector<1x1x32xf32> to vector<1x32xf32>
    %cst_62 = arith.constant dense<0.000000e+00> : vector<16xf32>
    %128 = vector.multi_reduction <add>, %123, %cst_62 [1] : vector<16x32xf32> to vector<16xf32>
    %129 = vector.shape_cast %128 : vector<16xf32> to vector<16x1xf32>
    %cst_63 = arith.constant 3.200000e+01 : f32
    %130 = vector.broadcast %cst_63 : f32 to vector<16x1xf32>
    %131 = arith.divf %129, %130 : vector<16x1xf32>
    %132 = vector.broadcast %131 : vector<16x1xf32> to vector<16x32xf32>
    %133 = arith.subf %123, %132 : vector<16x32xf32>
    %134 = arith.mulf %133, %133 : vector<16x32xf32>
    %cst_64 = arith.constant dense<0.000000e+00> : vector<16xf32>
    %135 = vector.multi_reduction <add>, %134, %cst_64 [1] : vector<16x32xf32> to vector<16xf32>
    %136 = vector.shape_cast %135 : vector<16xf32> to vector<16x1xf32>
    %cst_65 = arith.constant 3.200000e+01 : f32
    %137 = vector.broadcast %cst_65 : f32 to vector<16x1xf32>
    %138 = arith.divf %136, %137 : vector<16x1xf32>
    %139 = vector.broadcast %131 : vector<16x1xf32> to vector<16x32xf32>
    %140 = arith.subf %123, %139 : vector<16x32xf32>
    %cst_66 = arith.constant 9.99999974E-6 : f32
    %141 = vector.broadcast %cst_66 : f32 to vector<16x1xf32>
    %142 = arith.addf %138, %141 : vector<16x1xf32>
    %143 = math.rsqrt %142 : vector<16x1xf32>
    %144 = vector.broadcast %143 : vector<16x1xf32> to vector<16x32xf32>
    %145 = arith.mulf %140, %144 : vector<16x32xf32>
    %146 = vector.broadcast %125 : vector<1x32xf32> to vector<16x32xf32>
    %147 = arith.mulf %145, %146 : vector<16x32xf32>
    %148 = vector.broadcast %127 : vector<1x32xf32> to vector<16x32xf32>
    %149 = arith.addf %147, %148 : vector<16x32xf32>
    %150 = arith.truncf %149 : vector<16x32xf32> to vector<16x32xbf16>
    %c0_67 = arith.constant 0 : index
    %c0_68 = arith.constant 0 : index
    %c0_69 = arith.constant 0 : index
    %151 = vector.load %arg17[%c0_67, %c0_68, %c0_69] : memref<1x32x64xbf16, #tpu.memory_space<vmem>>, vector<1x32x64xbf16>
    %152 = vector.shape_cast %151 : vector<1x32x64xbf16> to vector<32x64xbf16>
    %cst_70 = arith.constant dense<0.000000e+00> : vector<16x64xf32>
    %153 = tpu.matmul %150, %152, %cst_70 {dimension_numbers = #tpu.dot_dimension_numbers<[1], [0], [0], [1], [0, 0, 1, 1], [], []>} : vector<16x32xbf16>, vector<32x64xbf16>, vector<16x64xf32> -> vector<16x64xf32>
    %c0_71 = arith.constant 0 : index
    %c0_72 = arith.constant 0 : index
    %c0_73 = arith.constant 0 : index
    %154 = vector.load %arg18[%c0_71, %c0_72, %c0_73] : memref<1x1x64xf32, #tpu.memory_space<vmem>>, vector<1x1x64xf32>
    %155 = vector.shape_cast %154 : vector<1x1x64xf32> to vector<1x64xf32>
    %156 = vector.broadcast %155 : vector<1x64xf32> to vector<16x64xf32>
    %157 = arith.addf %153, %156 : vector<16x64xf32>
    %cst_74 = arith.constant 0.000000e+00 : f32
    %158 = vector.broadcast %cst_74 : f32 to vector<16x64xf32>
    %159 = arith.maximumf %157, %158 : vector<16x64xf32>
    %160 = arith.truncf %159 : vector<16x64xf32> to vector<16x64xbf16>
    %c0_75 = arith.constant 0 : index
    %c0_76 = arith.constant 0 : index
    %c0_77 = arith.constant 0 : index
    %161 = vector.load %arg19[%c0_75, %c0_76, %c0_77] : memref<1x64x32xbf16, #tpu.memory_space<vmem>>, vector<1x64x32xbf16>
    %162 = vector.shape_cast %161 : vector<1x64x32xbf16> to vector<64x32xbf16>
    %cst_78 = arith.constant dense<0.000000e+00> : vector<16x32xf32>
    %163 = tpu.matmul %160, %162, %cst_78 {dimension_numbers = #tpu.dot_dimension_numbers<[1], [0], [0], [1], [0, 0, 1, 1], [], []>} : vector<16x64xbf16>, vector<64x32xbf16>, vector<16x32xf32> -> vector<16x32xf32>
    %c0_79 = arith.constant 0 : index
    %c0_80 = arith.constant 0 : index
    %c0_81 = arith.constant 0 : index
    %164 = vector.load %arg20[%c0_79, %c0_80, %c0_81] : memref<1x1x32xf32, #tpu.memory_space<vmem>>, vector<1x1x32xf32>
    %165 = vector.shape_cast %164 : vector<1x1x32xf32> to vector<1x32xf32>
    %166 = vector.broadcast %165 : vector<1x32xf32> to vector<16x32xf32>
    %167 = arith.addf %163, %166 : vector<16x32xf32>
    %168 = arith.addf %149, %167 : vector<16x32xf32>
    %c0_82 = arith.constant 0 : index
    %c0_83 = arith.constant 0 : index
    %c0_84 = arith.constant 0 : index
    %169 = vector.load %arg21[%c0_82, %c0_83, %c0_84] : memref<1x1x32xf32, #tpu.memory_space<vmem>>, vector<1x1x32xf32>
    %170 = vector.shape_cast %169 : vector<1x1x32xf32> to vector<1x32xf32>
    %c0_85 = arith.constant 0 : index
    %c0_86 = arith.constant 0 : index
    %c0_87 = arith.constant 0 : index
    %171 = vector.load %arg22[%c0_85, %c0_86, %c0_87] : memref<1x1x32xf32, #tpu.memory_space<vmem>>, vector<1x1x32xf32>
    %172 = vector.shape_cast %171 : vector<1x1x32xf32> to vector<1x32xf32>
    %cst_88 = arith.constant dense<0.000000e+00> : vector<16xf32>
    %173 = vector.multi_reduction <add>, %168, %cst_88 [1] : vector<16x32xf32> to vector<16xf32>
    %174 = vector.shape_cast %173 : vector<16xf32> to vector<16x1xf32>
    %cst_89 = arith.constant 3.200000e+01 : f32
    %175 = vector.broadcast %cst_89 : f32 to vector<16x1xf32>
    %176 = arith.divf %174, %175 : vector<16x1xf32>
    %177 = vector.broadcast %176 : vector<16x1xf32> to vector<16x32xf32>
    %178 = arith.subf %168, %177 : vector<16x32xf32>
    %179 = arith.mulf %178, %178 : vector<16x32xf32>
    %cst_90 = arith.constant dense<0.000000e+00> : vector<16xf32>
    %180 = vector.multi_reduction <add>, %179, %cst_90 [1] : vector<16x32xf32> to vector<16xf32>
    %181 = vector.shape_cast %180 : vector<16xf32> to vector<16x1xf32>
    %cst_91 = arith.constant 3.200000e+01 : f32
    %182 = vector.broadcast %cst_91 : f32 to vector<16x1xf32>
    %183 = arith.divf %181, %182 : vector<16x1xf32>
    %184 = vector.broadcast %176 : vector<16x1xf32> to vector<16x32xf32>
    %185 = arith.subf %168, %184 : vector<16x32xf32>
    %cst_92 = arith.constant 9.99999974E-6 : f32
    %186 = vector.broadcast %cst_92 : f32 to vector<16x1xf32>
    %187 = arith.addf %183, %186 : vector<16x1xf32>
    %188 = math.rsqrt %187 : vector<16x1xf32>
    %189 = vector.broadcast %188 : vector<16x1xf32> to vector<16x32xf32>
    %190 = arith.mulf %185, %189 : vector<16x32xf32>
    %191 = vector.broadcast %170 : vector<1x32xf32> to vector<16x32xf32>
    %192 = arith.mulf %190, %191 : vector<16x32xf32>
    %193 = vector.broadcast %172 : vector<1x32xf32> to vector<16x32xf32>
    %194 = arith.addf %192, %193 : vector<16x32xf32>
    %c0_93 = arith.constant 0 : index
    %c0_94 = arith.constant 0 : index
    %195 = vector.load %arg26[%c0_93, %c0_94] : memref<16x32xf32, #tpu.memory_space<vmem>>, vector<16x32xf32>
    tpu.vector_store %arg26[%c0_93, %c0_94], %194 {strides = array<i32>} : memref<16x32xf32, #tpu.memory_space<vmem>>, vector<16x32xf32>,
    %c1_i32 = arith.constant 1 : i32
    %196 = arith.cmpi eq, %arg1, %c1_i32 : i32
    %197 = arith.extui %196 : i1 to i32
    %c0_i32_95 = arith.constant 0 : i32
    %198 = arith.cmpi ne, %197, %c0_i32_95 : i32
    scf.if %198 {
      %c0_96 = arith.constant 0 : index
      %c0_97 = arith.constant 0 : index
      %199 = vector.load %arg23[%c0_96, %c0_97] : memref<1x32xbf16, #tpu.memory_space<vmem>>, vector<1x32xbf16>
      %200 = arith.truncf %194 : vector<16x32xf32> to vector<16x32xbf16>
      %cst_98 = arith.constant dense<0.000000e+00> : vector<1x16xf32>
      %201 = tpu.matmul %199, %200, %cst_98 {dimension_numbers = #tpu.dot_dimension_numbers<[1], [1], [0], [0], [0, 0, 1, 0], [], []>} : vector<1x32xbf16>, vector<16x32xbf16>, vector<1x16xf32> -> vector<1x16xf32>
      %c0_99 = arith.constant 0 : index
      %c0_100 = arith.constant 0 : index
      %202 = vector.load %arg24[%c0_99, %c0_100] : memref<1x1xf32, #tpu.memory_space<vmem>>, vector<1x1xf32>
      %203 = vector.broadcast %202 : vector<1x1xf32> to vector<1x16xf32>
      %204 = arith.addf %201, %203 : vector<1x16xf32>
      %205 = arith.negf %204 : vector<1x16xf32>
      %206 = math.exp %205 : vector<1x16xf32>
      %cst_101 = arith.constant 1.000000e+00 : f32
      %207 = vector.broadcast %cst_101 : f32 to vector<1x16xf32>
      %208 = arith.addf %207, %206 : vector<1x16xf32>
      %209 = arith.divf %207, %208 : vector<1x16xf32>
      %c0_102 = arith.constant 0 : index
      %c0_103 = arith.constant 0 : index
      %c0_104 = arith.constant 0 : index
      %210 = vector.load %arg25[%c0_102, %c0_103, %c0_104] : memref<1x1x16xf32, #tpu.memory_space<vmem>>, vector<1x1x16xf32>
      %211 = vector.shape_cast %210 : vector<1x1x16xf32> to vector<1x16xf32>
      %212 = vector.shape_cast %209 : vector<1x16xf32> to vector<1x1x16xf32>
      tpu.vector_store %arg25[%c0_102, %c0_103, %c0_104], %212 {strides = array<i32>} : memref<1x1x16xf32, #tpu.memory_space<vmem>>, vector<1x1x16xf32>,
    } else {
    }
    return
  }
  func.func @transform_0(%arg0: i32, %arg1: i32) -> (i32, i32) {
    %c0_i32 = arith.constant 0 : i32
    %c0_i32_0 = arith.constant 0 : i32
    return %arg0, %c0_i32 : i32, i32
  }
  func.func @transform_1(%arg0: i32, %arg1: i32) -> (i32, i32) {
    %c0_i32 = arith.constant 0 : i32
    %c0_i32_0 = arith.constant 0 : i32
    %c0_i32_1 = arith.constant 0 : i32
    return %c0_i32, %c0_i32_0 : i32, i32
  }
  func.func @transform_2(%arg0: i32, %arg1: i32) -> (i32, i32, i32) {
    %c0_i32 = arith.constant 0 : i32
    %c0_i32_0 = arith.constant 0 : i32
    %c0_i32_1 = arith.constant 0 : i32
    return %arg0, %c0_i32, %c0_i32_0 : i32, i32, i32
  }
  func.func @transform_3(%arg0: i32, %arg1: i32) -> (i32, i32) {
    %c0_i32 = arith.constant 0 : i32
    %c0_i32_0 = arith.constant 0 : i32
    %c0_i32_1 = arith.constant 0 : i32
    return %c0_i32, %c0_i32_0 : i32, i32
  }
  func.func @transform_4(%arg0: i32, %arg1: i32) -> (i32, i32) {
    %c0_i32 = arith.constant 0 : i32
    %c0_i32_0 = arith.constant 0 : i32
    %c0_i32_1 = arith.constant 0 : i32
    return %c0_i32, %c0_i32_0 : i32, i32
  }
  func.func @transform_5(%arg0: i32, %arg1: i32) -> (i32, i32, i32) {
    %c0_i32 = arith.constant 0 : i32
    %c0_i32_0 = arith.constant 0 : i32
    %c0_i32_1 = arith.constant 0 : i32
    return %arg1, %c0_i32, %c0_i32_0 : i32, i32, i32
  }
  func.func @transform_6(%arg0: i32, %arg1: i32) -> (i32, i32, i32) {
    %c0_i32 = arith.constant 0 : i32
    %c0_i32_0 = arith.constant 0 : i32
    %c0_i32_1 = arith.constant 0 : i32
    return %arg1, %c0_i32, %c0_i32_0 : i32, i32, i32
  }
  func.func @transform_7(%arg0: i32, %arg1: i32) -> (i32, i32, i32) {
    %c0_i32 = arith.constant 0 : i32
    %c0_i32_0 = arith.constant 0 : i32
    %c0_i32_1 = arith.constant 0 : i32
    return %arg1, %c0_i32, %c0_i32_0 : i32, i32, i32
  }
  func.func @transform_8(%arg0: i32, %arg1: i32) -> (i32, i32, i32) {
    %c0_i32 = arith.constant 0 : i32
    %c0_i32_0 = arith.constant 0 : i32
    %c0_i32_1 = arith.constant 0 : i32
    return %arg1, %c0_i32, %c0_i32_0 : i32, i32, i32
  }
  func.func @transform_9(%arg0: i32, %arg1: i32) -> (i32, i32, i32) {
    %c0_i32 = arith.constant 0 : i32
    %c0_i32_0 = arith.constant 0 : i32
    %c0_i32_1 = arith.constant 0 : i32
    return %arg1, %c0_i32, %c0_i32_0 : i32, i32, i32
  }
  func.func @transform_10(%arg0: i32, %arg1: i32) -> (i32, i32, i32) {
    %c0_i32 = arith.constant 0 : i32
    %c0_i32_0 = arith.constant 0 : i32
    %c0_i32_1 = arith.constant 0 : i32
    return %arg1, %c0_i32, %c0_i32_0 : i32, i32, i32
  }
  func.func @transform_11(%arg0: i32, %arg1: i32) -> (i32, i32, i32) {
    %c0_i32 = arith.constant 0 : i32
    %c0_i32_0 = arith.constant 0 : i32
    %c0_i32_1 = arith.constant 0 : i32
    return %arg1, %c0_i32, %c0_i32_0 : i32, i32, i32
  }
  func.func @transform_12(%arg0: i32, %arg1: i32) -> (i32, i32, i32) {
    %c0_i32 = arith.constant 0 : i32
    %c0_i32_0 = arith.constant 0 : i32
    %c0_i32_1 = arith.constant 0 : i32
    return %arg1, %c0_i32, %c0_i32_0 : i32, i32, i32
  }
  func.func @transform_13(%arg0: i32, %arg1: i32) -> (i32, i32, i32) {
    %c0_i32 = arith.constant 0 : i32
    %c0_i32_0 = arith.constant 0 : i32
    %c0_i32_1 = arith.constant 0 : i32
    return %arg1, %c0_i32, %c0_i32_0 : i32, i32, i32
  }
  func.func @transform_14(%arg0: i32, %arg1: i32) -> (i32, i32, i32) {
    %c0_i32 = arith.constant 0 : i32
    %c0_i32_0 = arith.constant 0 : i32
    %c0_i32_1 = arith.constant 0 : i32
    return %arg1, %c0_i32, %c0_i32_0 : i32, i32, i32
  }
  func.func @transform_15(%arg0: i32, %arg1: i32) -> (i32, i32, i32) {
    %c0_i32 = arith.constant 0 : i32
    %c0_i32_0 = arith.constant 0 : i32
    %c0_i32_1 = arith.constant 0 : i32
    return %arg1, %c0_i32, %c0_i32_0 : i32, i32, i32
  }
  func.func @transform_16(%arg0: i32, %arg1: i32) -> (i32, i32, i32) {
    %c0_i32 = arith.constant 0 : i32
    %c0_i32_0 = arith.constant 0 : i32
    %c0_i32_1 = arith.constant 0 : i32
    return %arg1, %c0_i32, %c0_i32_0 : i32, i32, i32
  }
  func.func @transform_17(%arg0: i32, %arg1: i32) -> (i32, i32, i32) {
    %c0_i32 = arith.constant 0 : i32
    %c0_i32_0 = arith.constant 0 : i32
    %c0_i32_1 = arith.constant 0 : i32
    return %arg1, %c0_i32, %c0_i32_0 : i32, i32, i32
  }
  func.func @transform_18(%arg0: i32, %arg1: i32) -> (i32, i32, i32) {
    %c0_i32 = arith.constant 0 : i32
    %c0_i32_0 = arith.constant 0 : i32
    %c0_i32_1 = arith.constant 0 : i32
    return %arg1, %c0_i32, %c0_i32_0 : i32, i32, i32
  }
  func.func @transform_19(%arg0: i32, %arg1: i32) -> (i32, i32, i32) {
    %c0_i32 = arith.constant 0 : i32
    %c0_i32_0 = arith.constant 0 : i32
    %c0_i32_1 = arith.constant 0 : i32
    return %arg1, %c0_i32, %c0_i32_0 : i32, i32, i32
  }
  func.func @transform_20(%arg0: i32, %arg1: i32) -> (i32, i32, i32) {
    %c0_i32 = arith.constant 0 : i32
    %c0_i32_0 = arith.constant 0 : i32
    %c0_i32_1 = arith.constant 0 : i32
    return %arg1, %c0_i32, %c0_i32_0 : i32, i32, i32
  }
  func.func @transform_21(%arg0: i32, %arg1: i32) -> (i32, i32) {
    %c0_i32 = arith.constant 0 : i32
    %c0_i32_0 = arith.constant 0 : i32
    %c0_i32_1 = arith.constant 0 : i32
    return %c0_i32, %c0_i32_0 : i32, i32
  }
  func.func @transform_22(%arg0: i32, %arg1: i32) -> (i32, i32) {
    %c0_i32 = arith.constant 0 : i32
    %c0_i32_0 = arith.constant 0 : i32
    %c0_i32_1 = arith.constant 0 : i32
    return %c0_i32, %c0_i32_0 : i32, i32
  }
  func.func @transform_23(%arg0: i32, %arg1: i32) -> (i32, i32, i32) {
    %c0_i32 = arith.constant 0 : i32
    %c0_i32_0 = arith.constant 0 : i32
    %c0_i32_1 = arith.constant 0 : i32
    return %arg0, %c0_i32, %c0_i32_0 : i32, i32, i32
  }
}

</mosaic_0001>

<bundles_post_ra>
// kernel: tpu_custom_call.1
= control target key start
LH: loop header
LB: loop body
LE: loop exit
PB: predicated region body
PF: predicated region fallthrough
CT: control target
= control target key end

     0   :  { %s3854_s0 = inlined_call_operand.hbm [shape: bf16[16,26], index: 0, kind: input, shape index: {}]   ;;  %s3855_s1 = inlined_call_operand.vmem [shape: f32[16,1], index: 1, kind: input, shape index: {}]   ;;  %s3856_s2 = inlined_call_operand.hbm [shape: f32[1,1,16], index: 2, kind: input, shape index: {}]   ;;  %s3857_s3 = inlined_call_operand.hbm [shape: bf16[26,32], index: 3, kind: input, shape index: {}]   ;;  %s3858_s4 = inlined_call_operand.hbm [shape: f32[1,32], index: 4, kind: input, shape index: {}]   ;;  %s3859_s5 = inlined_call_operand.vmem [shape: bf16[2,32,32], index: 5, kind: input, shape index: {}]   ;;  %s3860_s6 = inlined_call_operand.vmem [shape: f32[2,1,32], index: 6, kind: input, shape index: {}]   ;;  %s3861_s7 = inlined_call_operand.vmem [shape: bf16[2,32,32], index: 7, kind: input, shape index: {}]   ;;  %s3862_s8 = inlined_call_operand.hbm [shape: f32[2,1,32], index: 8, kind: input, shape index: {}]   ;;  %s3863_s9 = inlined_call_operand.vmem [shape: bf16[2,32,32], index: 9, kind: input, shape index: {}]   ;;  %s3864_s10 = inlined_call_operand.hbm [shape: f32[2,1,32], index: 10, kind: input, shape index: {}]   ;;  %s3865_s11 = inlined_call_operand.hbm [shape: bf16[2,32,32], index: 11, kind: input, shape index: {}]   ;;  %s3866_s12 = inlined_call_operand.hbm [shape: f32[2,1,32], index: 12, kind: input, shape index: {}]   ;;  %s3867_s13 = inlined_call_operand.hbm [shape: f32[2,1,32], index: 13, kind: input, shape index: {}]   ;;  %s3868_s14 = inlined_call_operand.hbm [shape: f32[2,1,32], index: 14, kind: input, shape index: {}]   ;;  %s3869_s15 = inlined_call_operand.hbm [shape: bf16[2,32,64], index: 15, kind: input, shape index: {}]   ;;  %s3870_s16 = inlined_call_operand.hbm [shape: f32[2,1,64], index: 16, kind: input, shape index: {}]   ;;  %s3871_s17 = inlined_call_operand.vmem [shape: bf16[2,64,32], index: 17, kind: input, shape index: {}]   ;;  %s3872_s18 = inlined_call_operand.vmem [shape: f32[2,1,32], index: 18, kind: input, shape index: {}]   ;;  %s3873_s19 = inlined_call_operand.hbm [shape: f32[2,1,32], index: 19, kind: input, shape index: {}]   ;;  %s3874_s20 = inlined_call_operand.vmem [shape: f32[2,1,32], index: 20, kind: input, shape index: {}]   ;;  %s3875_s21 = inlined_call_operand.hbm [shape: bf16[1,32], index: 21, kind: input, shape index: {}]   ;;  %s3876_s22 = inlined_call_operand.<no memory space> [shape: f32[1,1], index: 22, kind: input, shape index: {}]   ;;  %s3877_s23 = inlined_call_operand.hbm [shape: f32[1,1,16], index: 23, kind: output, shape index: {}]  }
   0x1   :  { %3888 = sst [smem:[#allocation33_spill]] %s3854_s0  ;;  %v28_v0 = vstv %s3876_s22 }
   0x2   :  { %3889 = sst [smem:[#allocation34_spill]] %s3855_s1  ;;  %29 = vst [vmem:[#allocation3] sm:$0x1] %v28_v0 }
   0x3   :  { %3890 = sst [smem:[#allocation35_spill]] %s3856_s2 }
   0x4   :  { %3891 = sst [smem:[#allocation36_spill]] %s3857_s3 }
   0x5   :  { %3892 = sst [smem:[#allocation37_spill]] %s3858_s4 }
   0x6   :  { %3893 = sst [smem:[#allocation38_spill]] %s3859_s5 }
   0x7   :  { %3894 = sst [smem:[#allocation39_spill]] %s3860_s6 }
   0x8   :  { %3895 = sst [smem:[#allocation40_spill]] %s3861_s7 }
   0x9   :  { %3896 = sst [smem:[#allocation41_spill]] %s3862_s8 }
   0xa   :  { %3897 = sst [smem:[#allocation42_spill]] %s3863_s9 }
   0xb   :  { %3898 = sst [smem:[#allocation43_spill]] %s3864_s10 }
   0xc   :  { %3899 = sst [smem:[#allocation44_spill]] %s3865_s11 }
   0xd   :  { %3900 = sst [smem:[#allocation45_spill]] %s3866_s12 }
   0xe   :  { %3901 = sst [smem:[#allocation46_spill]] %s3867_s13 }
   0xf   :  { %3902 = sst [smem:[#allocation47_spill]] %s3868_s14 }
  0x10   :  { %3903 = sst [smem:[#allocation48_spill]] %s3869_s15 }
  0x11   :  { %3904 = sst [smem:[#allocation49_spill]] %s3870_s16 }
  0x12   :  { %3905 = sst [smem:[#allocation50_spill]] %s3871_s17 }
  0x13   :  { %3906 = sst [smem:[#allocation51_spill]] %s3872_s18 }
  0x14   :  { %3907 = sst [smem:[#allocation52_spill]] %s3873_s19 }
  0x15   :  { %3908 = sst [smem:[#allocation53_spill]] %s3874_s20 }
  0x16   :  { %3909 = sst [smem:[#allocation54_spill]] %s3877_s23 }
  0x17   :  { %30 = vsyncpa [#allocation5], 0 }
  0x18   :  { %31 = vsyncpa [#allocation8], 0 }
  0x19   :  { %32 = vsyncpa [#allocation11], 0 }
  0x1a   :  { %33 = vsyncpa [#allocation6], 0  ;;  %s3413_s24 = smov 0   ;;  %s3415_s25 = smov 0  }
  0x1b   :  { %s3417_s5 = smov 0   ;;  %s3419_s1 = smov 0  }
  0x1c   :  { %s3421_s26 = smov 0   ;;  %s3423_s2 = smov 0  }
  0x1d LB: > { %3910 = sst [smem:[#allocation29_spill]] %s3262_s1  ;;  %s3442_s22 = sadd.s32 4294967295, %s3270_s2   ;;  %s3270_s2 = sphi %s3423_s2, %s39_s2   ;;  %s3266_s26 = sphi %s3421_s26, %s3966_s26   ;;  %s3262_s1 = sphi %s3419_s1, %s3965_s1   ;;  %s3258_s5 = sphi %s3417_s5, %s3964_s5   ;;  %s3254_s25 = sphi %s3415_s25, %s3963_s25   ;;  %s3250_s24 = sphi %s3413_s24, %s3962_s24  }
  0x1e   : > { %3911 = sst [smem:[#allocation30_spill]] %s3270_s2  ;;  %p258_p0 = scmp.ne.s32.totalorder %s3258_s5, %s3254_s25 }
  0x1f   : > { %p259_p1 = scmp.eq.s32.totalorder %s3270_s2, 0  ;;  %p264_p2 = scmp.ne.s32.totalorder %s3254_s25, %s3250_s24 }
  0x20   : > { %p265_p3 = scmp.eq.s32.totalorder %s3442_s22, 0  ;;  %p2368_p5 = scmp.ge.s32.totalorder %s3270_s2, 1 }
  0x21   : > { %p3450_p4 = por %p259_p1, %p258_p0  ;;  %p655_p7 = scmp.lt.s32.totalorder %s3270_s2, 3 }
  0x22   : > { %p3457_p6 = por %p265_p3, %p264_p2  ;;  %s3914_s3 = sld [smem:[#allocation33_spill]] }
  0x23   : > { %p3465_p8 = pnand %p2368_p5, %p655_p7  ;;  %s3272_s30 = smov [#allocation4]  }
  0x24   : > { %s671_s24 = sshll.u32 %s3272_s30, 4  ;;  %p2602_p11 = scmp.lt.s32.totalorder %s3270_s2, 2  ;;  %s672_s24 = int_to_ptr.vmem [resolvable:$true] %s671_s24 }
  0x25   : > { %p2553_p9 = pneg %p3465_p8  ;;  %s3879_s28 = smov 64  }
  0x26   : > { %s3881_s29 = smov 4   ;;  %p3485_p12 = pnand %p2602_p11, %p3450_p4 }
  0x27   : > { %p3473_p10 = pnand %p2553_p9, %p265_p3  ;;  %s48_s30 = sadd.s32 1, %s3266_s26 }
  0x28   : > { %s669_s0 = sshll.u32 %s3914_s3, 4  ;;  %p49_p13 = scmp.ge.s32.totalorder %s48_s30, 2  ;;  %s670_s0 = int_to_ptr.hbm [resolvable:$true] %s669_s0 }
  0x29   : > { %2556 = dma.hbm_to_vmem [thread:$0]  (!%p3473_p10), %s670_s0, 128, %s672_s24, [#allocation5], %s3879_s28, %s3879_s28, %s3881_s29  }
  0x2a   : > { %s764_s23 = sand.u32 1, %s3270_s2   ;;  %s3968_s30 = smov (%p49_p13, %s48_s30), 0 }
  0x2b   : > { %3918 = sst [smem:[#allocation31_spill]] %s3968_s30  ;;  %s3494_s20 = sand.u32 1, %s3258_s5  }
  0x2c   : > { %s3919_s8 = sld [smem:[#allocation41_spill]]  ;;  %s248_s0 = ssub.s32 %s3266_s26, %s3968_s30 }
  0x2d   : > { %p249_p0 = scmp.eq.s32.totalorder %s248_s0, 0  ;;  %s767_s28 = scalar_lea.vmem [#allocation12], %s3494_s20 }
  0x2e   : > { %s774_s29 = sshll.u32 %s767_s28, 4  ;;  %s3920_s2 = sadd.s32 1, %s3258_s5  ;;  %s775_s29 = int_to_ptr.vmem [resolvable:$true] %s774_s29 }
  0x2f   : > { %s3506_s9 = scalar_select %p249_p0, %s3258_s5, %s3920_s2  }
  0x30   : > { %s3508_s1 = scalar_lea.sflag [#allocation5], %s764_s23  ;;  %s3922_s10 = sld [smem:[#allocation43_spill]] }
  0x31   : > { %3921 = sst [smem:[#allocation32_spill]] %s3506_s9  ;;  %s792_s0 = scalar_lea.vmem [#allocation13], %s3494_s20 }
  0x32   : > { %s770_s27 = scalar_lea.hbm %s3919_s8, %s3266_s26  ;;  %s799_s28 = sshll.u32 %s792_s0, 4  ;;  %s800_s28 = int_to_ptr.vmem [resolvable:$true] %s799_s28 }
  0x33   : > { %s772_s24 = sshll.u32 %s770_s27, 4  ;;  %s3887_s2 = sshll.u32 %s3494_s20, 4  ;;  %s773_s24 = int_to_ptr.hbm [resolvable:$true] %s772_s24 }
  0x34   : > { %2572 = dma.hbm_to_vmem [thread:$0]  (!%p3485_p12), %s773_s24, 16, %s775_s29, %s3508_s1  }
  0x35   : > { %s3886_s23 = sshll.u32 %s3266_s26, 4  ;;  %s3923_s11 = sld [smem:[#allocation44_spill]] }
  0x36   : > { %s795_s27 = scalar_lea.hbm %s3922_s10, %s3266_s26  ;;  %s810_s18 = scalar_lea.vmem [#allocation14], %s3887_s2 }
  0x37   : > { %s797_s8 = sshll.u32 %s795_s27, 4  ;;  %s818_s10 = sshll.u32 %s810_s18, 4  ;;  %s798_s8 = int_to_ptr.hbm [resolvable:$true] %s797_s8  ;;  %s819_s10 = int_to_ptr.vmem [resolvable:$true] %s818_s10 }
  0x38   : > { %2575 = dma.hbm_to_vmem [thread:$0]  (!%p3485_p12), %s798_s8, 16, %s800_s28, %s3508_s1  }
  0x39   : > { %s3924_s27 = smov 4   ;;  %s3925_s30 = smov 64  }
  0x3a   : > { %s3926_s12 = sld [smem:[#allocation45_spill]]  ;;  %s831_s24 = scalar_lea.vmem [#allocation15], %s3494_s20 }
  0x3b   : > { %s815_s17 = scalar_lea.hbm %s3923_s11, %s3886_s23  ;;  %s838_s23 = sshll.u32 %s831_s24, 4  ;;  %s839_s23 = int_to_ptr.vmem [resolvable:$true] %s838_s23 }
  0x3c   : > { %s816_s0 = sshll.u32 %s815_s17, 4  ;;  %s3927_s13 = sld [smem:[#allocation46_spill]]  ;;  %s817_s0 = int_to_ptr.hbm [resolvable:$true] %s816_s0 }
  0x3d   : > { %2578 = dma.hbm_to_vmem [thread:$0]  (!%p3485_p12), %s817_s0, 256, %s819_s10, %s3508_s1, %s3925_s30, %s3925_s30, %s3924_s27  }
  0x3e   : > { %s848_s9 = scalar_lea.vmem [#allocation16], %s3494_s20  ;;  %s3928_s14 = sld [smem:[#allocation47_spill]] }
  0x3f   : > { %s855_s10 = sshll.u32 %s848_s9, 4  ;;  %s865_s24 = scalar_lea.vmem [#allocation17], %s3494_s20  ;;  %s856_s10 = int_to_ptr.vmem [resolvable:$true] %s855_s10 }
  0x40   : > { %s834_s29 = scalar_lea.hbm %s3926_s12, %s3266_s26  ;;  %s3929_s17 = sld [smem:[#allocation35_spill]] }
  0x41   : > { %s836_s2 = sshll.u32 %s834_s29, 4  ;;  %s3930_s8 = sshll.u32 %s3266_s26, 4  ;;  %s837_s2 = int_to_ptr.hbm [resolvable:$true] %s836_s2 }
  0x42   : > { %2581 = dma.hbm_to_vmem [thread:$0]  (!%p3485_p12), %s837_s2, 16, %s839_s23, %s3508_s1  }
  0x43   : > { %s851_s11 = scalar_lea.hbm %s3927_s13, %s3266_s26  ;;  %s872_s2 = sshll.u32 %s865_s24, 4  ;;  %s873_s2 = int_to_ptr.vmem [resolvable:$true] %s872_s2 }
  0x44   : > { %s853_s0 = sshll.u32 %s851_s11, 4  ;;  %s868_s29 = scalar_lea.hbm %s3928_s14, %s3266_s26  ;;  %s854_s0 = int_to_ptr.hbm [resolvable:$true] %s853_s0 }
  0x45   : > { %2584 = dma.hbm_to_vmem [thread:$0]  (!%p3485_p12), %s854_s0, 16, %s856_s10, %s3508_s1  }
  0x46   : > { %s870_s23 = sshll.u32 %s868_s29, 4  ;;  %s688_s18 = sshll.u32 %s3929_s17, 4  ;;  %s871_s23 = int_to_ptr.hbm [resolvable:$true] %s870_s23  ;;  %s689_s18 = int_to_ptr.hbm [resolvable:$true] %s688_s18 }
  0x47   : > { %2587 = dma.hbm_to_vmem [thread:$0]  (!%p3485_p12), %s871_s23, 16, %s873_s2, %s3508_s1  }
  0x48   : > { %s3275_s10 = smov [#allocation7]   ;;  %s3931_s15 = sld [smem:[#allocation48_spill]] }
  0x49   : > { %s690_s0 = sshll.u32 %s3275_s10, 4  ;;  %s3932_s13 = sshll.u32 %s3494_s20, 4  ;;  %s691_s0 = int_to_ptr.vmem [resolvable:$true] %s690_s0 }
  0x4a   : > { %2559 = dma.hbm_to_vmem [thread:$0]  (!%p3473_p10), %s689_s18, 16, %s691_s0, [#allocation8]  }
  0x4b   : > { %s883_s9 = scalar_lea.vmem [#allocation18], %s3932_s13  ;;  %s3933_s17 = sld [smem:[#allocation36_spill]] }
  0x4c   : > { %s891_s11 = sshll.u32 %s883_s9, 4  ;;  %s3934_s16 = sld [smem:[#allocation49_spill]]  ;;  %s892_s11 = int_to_ptr.vmem [resolvable:$true] %s891_s11 }
  0x4d   : > { %s904_s24 = scalar_lea.vmem [#allocation19], %s3494_s20  ;;  %s3935_s2 = sld [smem:[#allocation37_spill]] }
  0x4e   : > { %s888_s29 = scalar_lea.hbm %s3931_s15, %s3930_s8  ;;  %s3276_s8 = smov [#allocation9]  }
  0x4f   : > { %s889_s12 = sshll.u32 %s888_s29, 4  ;;  %s701_s18 = sshll.u32 %s3276_s8, 4  ;;  %s890_s12 = int_to_ptr.hbm [resolvable:$true] %s889_s12  ;;  %s702_s18 = int_to_ptr.vmem [resolvable:$true] %s701_s18 }
  0x50   : > { %2590 = dma.hbm_to_vmem [thread:$0]  (!%p3485_p12), %s890_s12, 256, %s892_s11, %s3508_s1, %s3925_s30, %s3925_s30, %s3924_s27  }
  0x51   : > { %s699_s10 = sshll.u32 %s3933_s17, 4  ;;  %s911_s12 = sshll.u32 %s904_s24, 4  ;;  %s700_s10 = int_to_ptr.hbm [resolvable:$true] %s699_s10  ;;  %s912_s12 = int_to_ptr.vmem [resolvable:$true] %s911_s12 }
  0x52   : > { %2562 = dma.hbm_to_vmem [thread:$0]  (!%p3473_p10), %s700_s10, 256, %s702_s18, [#allocation8], %s3925_s30, %s3925_s30, %s3924_s27  }
  0x53   : > { %s907_s28 = scalar_lea.hbm %s3934_s16, %s3266_s26  ;;  %s714_s23 = sshll.u32 %s3935_s2, 4  ;;  %s715_s23 = int_to_ptr.hbm [resolvable:$true] %s714_s23 }
  0x54   : > { %s909_s29 = sshll.u32 %s907_s28, 4  ;;  %s3277_s30 = smov [#allocation10]   ;;  %s910_s29 = int_to_ptr.hbm [resolvable:$true] %s909_s29 }
  0x55   : > { %2593 = dma.hbm_to_vmem [thread:$0]  (!%p3485_p12), %s910_s29, 16, %s912_s12, %s3508_s1  }
  0x56   : > { %s716_s27 = sshll.u32 %s3277_s30, 4  ;;  %s726_s8 = sshll.u32 %s3875_s21, 4  ;;  %s717_s27 = int_to_ptr.vmem [resolvable:$true] %s716_s27  ;;  %s727_s8 = int_to_ptr.hbm [resolvable:$true] %s726_s8 }
  0x57   : > { %2565 = dma.hbm_to_vmem [thread:$0]  (!%p3473_p10), %s715_s23, 16, %s717_s27, [#allocation11]  }
  0x58   : > { %s3278_s18 = smov [#allocation21]   ;;  %s3936_s19 = sld [smem:[#allocation52_spill]] }
  0x59   : > { %s728_s13 = sshll.u32 %s3278_s18, 4  ;;  %s935_s29 = scalar_lea.vmem [#allocation20], %s3494_s20  ;;  %s729_s13 = int_to_ptr.vmem [resolvable:$true] %s728_s13 }
  0x5a   : > { %2568 = dma.hbm_to_vmem [thread:$0]  (!%p3473_p10), %s727_s8, 16, %s729_s13, [#allocation8]  }
  0x5b   : > { %s942_s9 = sshll.u32 %s935_s29, 4  ;;  %s943_s9 = int_to_ptr.vmem [resolvable:$true] %s942_s9 }
  0x5c   : > { %957 = sbr.rel (%p3465_p8) target bundleno = 2358 (0x936), region = 112 }
  0x5e   : > { %s938_s24 = scalar_lea.hbm %s3936_s19, %s3266_s26 }
  0x5f   : > { %s940_s12 = sshll.u32 %s938_s24, 4  ;;  %s941_s12 = int_to_ptr.hbm [resolvable:$true] %s940_s12 }
  0x60   : > { %2596 = dma.hbm_to_vmem [thread:$0]  (!%p3485_p12), %s941_s12, 16, %s943_s9, %s3508_s1  }
  0x61   : > { %3225 = dma.done.wait (%p265_p3), [#allocation5], 128  }
  0x62   : > { %3227 = vsyncadd (%p265_p3), [#allocation5], 4294967168 }
  0x63   : > { %3229 = dma.done.wait (%p265_p3), [#allocation8], 272  }
  0x64   : > { %3231 = vsyncadd (%p265_p3), [#allocation8], 4294967024 }
  0x65   : > { %3233 = dma.done.wait (%p265_p3), [#allocation11], 16  }
  0x66   : > { %3235 = vsyncadd (%p265_p3), [#allocation11], 4294967280  ;;  %s979_s20 = sand.u32 1, %s3442_s22   ;;  %s3628_s1 = sand.u32 1, %s3254_s25  }
  0x67   : > { %s980_s6 = scalar_lea.sflag [#allocation5], %s979_s20 }
  0x68   : > { %3237 = dma.done.wait (%p3457_p6), %s980_s6, 624  }
  0x69   : > { %3239 = vsyncadd (%p3457_p6), %s980_s6, 4294966672  ;;  %s2386_s3 = sshll.u32 %s3628_s1, 4 }
  0x6a   : > { %s3637_s2 = scalar_lea.vmem [#allocation14], %s2386_s3  ;;  %s3642_s17 = scalar_lea.vmem [#allocation18], %s2386_s3 }
  0x6b   : > { %3241 = dma.done.wait (%p265_p3), [#allocation8], 16  }
  0x6c   : > { %3243 = vsyncadd (%p265_p3), [#allocation8], 4294967280  ;;  %s3937_s8 = sld [smem:[#allocation29_spill]] }
  0x6d   : > { %s3939_s20 = sld [smem:[#allocation38_spill]] }
  0x6e   : > { %s3940_s10 = sld [smem:[#allocation40_spill]] }
  0x6f   : > { %s3941_s11 = sld [smem:[#allocation42_spill]] }
  0x70   : > { %s3942_s0 = sld [smem:[#allocation50_spill]] }
  0x71   : > { %s3943_s9 = sld [smem:[#allocation51_spill]] }
  0x72   : > { %p1183_p1 = scmp.lt.s32.totalorder %s3937_s8, 1  ;;  %s3944_s7 = sld [smem:[#allocation53_spill]] }
  0x73   : > { %p2397_p2 = scmp.ne.s32.totalorder %s3937_s8, 0 }
  0x74   : > { %s3652_s18 = scalar_select %p1183_p1, %s3937_s8, 1 }
  0x75   : > { %1216 = sbr.rel (%p2397_p2) target bundleno = 270 (0x10e), region = 172 }
  0x76   : > { %s2490_s13 = sshll.u32 %s3652_s18, 4  ;;  %s2493_s14 = sshll.u32 %s3652_s18, 5 }
  0x77   : > { %s3662_s6 = scalar_lea.vmem %s3939_s20, %s2490_s13  ;;  %s3667_s27 = scalar_lea.vmem %s3940_s10, %s2490_s13 }
  0x78   : > { %s3672_s4 = scalar_lea.vmem %s3941_s11, %s2490_s13  ;;  %s3678_s28 = scalar_lea.vmem %s3942_s0, %s2493_s14 }
  0x79   : > { %s1208_s20 = scalar_lea.vmem %s3943_s9, %s3652_s18  ;;  %s1211_s10 = scalar_lea.vmem %s3944_s7, %s3652_s18 }
  0x7a   : > { %v2408_v1 = vld [vmem:[#allocation9 + $0x8] sm:$0xf]  ;;  %v2496_v2 = vld [vmem:[#allocation9 + $0x8] sm:$0x10]  ;;  %vm1247_vm0 = vcmask 1044480   ;;  %v2495_v5 = vld [vmem:[#allocation9] sm:$0xff] }
  0x7b   : > { %v2409_v3 = vor.u32 %v2496_v2, %v2408_v1  ;;  %v2494_v6 = vld [vmem:[#allocation4] sm:$0xff]  ;;  %vm1243_vm1 = vcmask 211968   ;;  %v2676_v7 = vld [vmem:[#allocation10] ss:$0 sm:$0xff]  ;;  %vm1265_vm2 = vcmask 261120  }
  0x7d   : > { %v1249_v4 = vsel %vm1247_vm0, %v2409_v3, 0 }
  0x7e   : > { %1257 = vmatpush.bf16.msra.mxu0 %v1249_v4 }
  0x82   : > { %1258 = vmatpush.bf16.msra.mxu0 %v2495_v5 }
  0x85   : > { %2410 = vmatmul.msk.bf16.vlgmr.msra.gmra.mxu0 %vm1243_vm1, %v2494_v6 }
 0x102   : > { %v1260_v8 = vpop.f32.mrf.mxu0 }
 0x103   : > { %v1261_v9 = vadd.f32 %v2676_v7, %v1260_v8 }
 0x105   : > { %1266 = vst.msk [vmem:[#allocation2] sm:$0xff] %vm1265_vm2, %v1261_v9 }
 0x10a   : > { %v1262_v10 = vpop.f32.mrf.mxu0 }
 0x10b   : > { %v1263_v11 = vadd.f32 %v2676_v7, %v1262_v10 }
 0x10d   : > { %1267 = vst.msk [vmem:[#allocation2 + $0x8] sm:$0xff] %vm1265_vm2, %v1263_v11 }
 0x10e PF: > { %v2498_v12 = vld [vmem:[%s3662_s6 + $0x8] sm:$0xff]  ;;  %v2497_v14 = vld [vmem:[%s3662_s6] sm:$0xff]  ;;  %vm1311_vm3 = vcmask 261120   ;;  %v3279_v19 = vmov 0   ;;  %s3945_s16 = sld [smem:[#allocation39_spill]]  ;;  %s3947_s11 = scalar_lea.vmem [#allocation12], %s3628_s1 }
 0x10f   : > { %v2500_v13 = vld [vmem:[%s3667_s27 + $0x8] sm:$0xff]  ;;  %v2499_v15 = vld [vmem:[%s3667_s27] sm:$0xff]  ;;  %1321 = vmatpush.bf16.msra.mxu0 %v2498_v12  ;;  %2677 = vset.pattern.permute.xlu0 %v3279_v19  ;;  %vm1413_vm4 = vcmask 64512   ;;  %s3280_s23 = smov 112   ;;  %s3281_s30 = smov 120   ;;  %vm1438_vm6 = vcmask 130048  }
 0x110   : > { %v3693_v16 = vld [vmem:[#allocation2] sm:$0xff]  ;;  %1355 = vmatpush.bf16.msra.mxu1 %v2500_v13  ;;  %2678 = vset.pattern.permute.xlu1 %v3279_v19  ;;  %s3282_s27 = smov 104   ;;  %s3948_s12 = sld [smem:[#allocation34_spill]]  ;;  %v2696_v51 = vld [vmem:[#allocation7] ss:$0 sm:$0xff]  ;;  %v2502_v2 = vld [vmem:[%s3672_s4 + $0x8] sm:$0xff] }
 0x111   : > { %v2695_v23 = vld [vmem:[%s3947_s11] ss:$0 sm:$0xff]  ;;  %v3283_v54 = vmov -1e+09   ;;  %1389 = vmatpush.bf16.msra.mxu2 %v2502_v2  ;;  %s3284_s0 = smov 8   ;;  %s3285_s24 = smov 24  }
 0x112   : > { %v2501_v3 = vld [vmem:[%s3672_s4] sm:$0xff]  ;;  %s3949_s4 = scalar_lea.vmem [#allocation13], %s3628_s1  ;;  %s3286_s29 = smov 16   ;;  %vm1726_vm8 = vcmask 195584   ;;  %vm1909_vm0 = vcmask 523264  }
 0x113   : > { %1322 = vmatpush.bf16.msra.mxu0 %v2497_v14  ;;  %s3952_s9 = scalar_lea.vmem [#allocation17], %s3628_s1  ;;  %s3953_s7 = scalar_lea.vmem [#allocation19], %s3628_s1 }
 0x114   : > { %v3695_v17 = vld [vmem:[#allocation2 + $0x8] sm:$0xff]  ;;  %1356 = vmatpush.bf16.msra.mxu1 %v2499_v15  ;;  %s3946_s19 = scalar_lea.vmem %s3945_s16, %s3652_s18 }
 0x115   : > { %v3699_v18 = vpack.c.bf16 %v3695_v17, %v3693_v16  ;;  %v2694_v20 = vld [vmem:[%s3946_s19] ss:$0 sm:$0xff]  ;;  %1390 = vmatpush.bf16.msra.mxu2 %v2501_v3 }
 0x116   : > { %v1270_v41 = vld [vmem:[%s3948_s12] sm:$0xff]  ;;  %v1271_v42 = vld [vmem:[%s3948_s12 + $0x8] sm:$0xff] }
 0x117   : > { %2419 = vmatmul.msk.bf16.vlgmr.msra.gmra.mxu0 %vm1311_vm3, %v3699_v18  ;;  %2428 = vmatmul.msk.bf16.vlgmr.msra.gmra.mxu1 %vm1311_vm3, %v3699_v18 }
 0x118   : > { %2437 = vmatmul.msk.bf16.vlgmr.msra.gmra.mxu2 %vm1311_vm3, %v3699_v18 }
 0x194   : > { %v1324_v21 = vpop.f32.mrf.mxu0  ;;  %v1358_v22 = vpop.f32.mrf.mxu1 }
 0x195   : > { %v1325_v24 = vadd.f32 %v2694_v20, %v1324_v21  ;;  %v1359_v25 = vadd.f32 %v2695_v23, %v1358_v22 }
 0x197   : > { %v1397_v26 = vpack.c.bf16 %v1325_v24, %v1325_v24  ;;  %v1399_v29 = vpack.c.bf16 %v1359_v25, %v1359_v25 }
 0x199   : > { %v1405_v32 = vunpack.c.l.b16 %v1397_v26  ;;  %v1410_v35 = vunpack.c.l.b16 %v1399_v29 }
 0x19c   : > { %v1326_v27 = vpop.f32.mrf.mxu0  ;;  %v1360_v28 = vpop.f32.mrf.mxu1 }
 0x19d   : > { %v1327_v30 = vadd.f32 %v2694_v20, %v1326_v27  ;;  %v1361_v31 = vadd.f32 %v2695_v23, %v1360_v28 }
 0x19f   : > { %v1398_v33 = vpack.c.bf16 %v1327_v30, %v1327_v30  ;;  %v1400_v34 = vpack.c.bf16 %v1361_v31, %v1361_v31 }
 0x1a1   : > { %v1406_v36 = vunpack.c.l.b16 %v1398_v33  ;;  %v1411_v37 = vunpack.c.l.b16 %v1400_v34 }
 0x1a3   : > { %v1407_v38 = vpack.c.b16 %v1406_v36, %v1405_v32  ;;  %v1412_v39 = vpack.c.b16 %v1411_v37, %v1410_v35 }
 0x1a5   : > { %1558 = vrot.lane.b32.xlu1 %v1412_v39, %s3280_s23  ;;  %1487 = vrot.lane.b32.xlu0 %v1412_v39, %s3281_s30  ;;  %v1418_v40 = vsel %vm1413_vm4, %v1412_v39, 0 }
 0x1a6   : > { %1556 = vrot.lane.b32.xlu2 %v1407_v38, %s3280_s23  ;;  %1427 = vmatpush.bf16.xpose.msra.mxu3 %v1418_v40  ;;  %v1392_v40 = vpop.f32.mrf.mxu2 }
 0x1ad   : > { %1629 = vrot.lane.b32.xlu1 %v1412_v39, %s3282_s27  ;;  %1485 = vrot.lane.b32.xlu0 %v1407_v38, %s3281_s30 }
 0x1ae   : > { %1627 = vrot.lane.b32.xlu2 %v1407_v38, %s3282_s27  ;;  %2438 = vmatmul.msk.bf16.vlgmr.msra.gmra.mxu3 %vm1413_vm4, %v1407_v38 }
 0x1b5   : > { %1275 = vperm.xlu0 %2677, %v1270_v41   ;;  %1280 = vperm.xlu1 %2678, %v1271_v42   ;;  %v2697_v41 = vld [vmem:[%s3949_s4] ss:$0 sm:$0xff] }
 0x200   : > { %v1557_v47 = vpop.permute.xlu2 %1556 }
 0x208   : > { %v1628_v53 = vpop.permute.xlu2 %1627 }
 0x217   : > { %v1559_v43 = vpop.permute.xlu1 %1558  ;;  %v1488_v44 = vpop.permute.xlu0 %1487 }
 0x218   : > { %v1493_v45 = vsel %vm1413_vm4, %v1488_v44, 0  ;;  %v1564_v46 = vsel %vm1413_vm4, %v1559_v43, 0  ;;  %v1393_v43 = vadd.f32 %v2697_v41, %v1392_v40 }
 0x219   : > { %1502 = vmatpush.bf16.xpose.msrb.mxu1 %v1493_v45  ;;  %1573 = vmatpush.bf16.xpose.msrb.mxu3 %v1564_v46  ;;  %v1394_v45 = vpop.f32.mrf.mxu2 }
 0x21a   : > { %v1401_v46 = vpack.c.bf16 %v1393_v43, %v1393_v43 }
 0x21f   : > { %v1630_v48 = vpop.permute.xlu1 %1629  ;;  %v1486_v49 = vpop.permute.xlu0 %1485 }
 0x220   : > { %v1635_v50 = vsel %vm1413_vm4, %v1630_v48, 0  ;;  %2440 = vmatmul.msk.bf16.vlgmr.msrb.gmra.mxu1 %vm1413_vm4, %v1486_v49  ;;  %2442 = vmatmul.msk.bf16.vlgmr.msrb.gmra.mxu3 %vm1413_vm4, %v1557_v47  ;;  %v1395_v47 = vadd.f32 %v2697_v41, %v1394_v45  ;;  %v1464_v49 = vunpack.c.l.b16 %v1401_v46 }
 0x221   : > { %1644 = vmatpush.bf16.xpose.msra.mxu1 %v1635_v50 }
 0x222   : > { %v1402_v50 = vpack.c.bf16 %v1395_v47, %v1395_v47 }
 0x227   : > { %v1276_v52 = vpop.permute.xlu0 %1275  ;;  %v1281_v58 = vpop.permute.xlu1 %1280 }
 0x228   : > { %vm1286_vm5 = vcmp.eq.f32.partialorder %v1276_v52, %v2696_v51  ;;  %vm1287_vm7 = vcmp.eq.f32.partialorder %v1281_v58, %v2696_v51  ;;  %v1465_v51 = vunpack.c.l.b16 %v1402_v50 }
 0x229   : > { %v1288_v55 = vsel %vm1286_vm5, 0.0, %v3283_v54  ;;  %v1289_v61 = vsel %vm1287_vm7, 0.0, %v3283_v54 }
 0x22a   : > { %v1466_v54 = vpack.c.b16 %v1465_v51, %v1464_v49 }
 0x22c   : > { %1478 = vmatpush.bf16.msrb.mxu0 %v1466_v54 }
 0x230   : > { %2444 = vmatmul.msk.bf16.vlgmr.msra.gmra.mxu1 %vm1413_vm4, %v1628_v53 }
 0x231   : > { %v1429_v56 = vpop.f32.mrf.mxu3 }
 0x232   : > { %v1434_v57 = vmul.f32 0.35355338, %v1429_v56 }
 0x234   : > { %v1436_v59 = vadd.f32 %v1434_v57, %v1288_v55 }
 0x236   : > { %v1439_v60 = vsel %vm1438_vm6, %v1436_v59, -inf }
 0x237   : > { %1440 = vmax.xlane.f32.xlu0 %v1439_v60 }
 0x239   : > { %v1431_v62 = vpop.f32.mrf.mxu3 }
 0x23a   : > { %v1435_v63 = vmul.f32 0.35355338, %v1431_v62 }
 0x23c   : > { %v1437_v0 = vadd.f32 %v1435_v63, %v1289_v61 }
 0x23e   : > { %v1442_v1 = vsel %vm1438_vm6, %v1437_v0, -inf }
 0x23f   : > { %1443 = vmax.xlane.f32.xlu2 %v1442_v1 }
 0x29d   : > { %v1504_v4 = vpop.f32.mrf.mxu1 }
 0x29e   : > { %v1509_v5 = vmul.f32 0.35355338, %v1504_v4 }
 0x2a0   : > { %v1511_v6 = vadd.f32 %v1509_v5, %v1288_v55 }
 0x2a2   : > { %v1513_v7 = vsel %vm1438_vm6, %v1511_v6, -inf }
 0x2a3   : > { %v1575_v8 = vpop.f32.mrf.mxu3  ;;  %1514 = vmax.xlane.f32.xlu2 %v1513_v7 }
 0x2a4   : > { %v1580_v9 = vmul.f32 0.35355338, %v1575_v8 }
 0x2a5   : > { %v1506_v10 = vpop.f32.mrf.mxu1 }
 0x2a6   : > { %v1510_v11 = vmul.f32 0.35355338, %v1506_v10  ;;  %v1582_v12 = vadd.f32 %v1580_v9, %v1288_v55 }
 0x2a8   : > { %v1512_v13 = vadd.f32 %v1510_v11, %v1289_v61  ;;  %v1584_v19 = vsel %vm1438_vm6, %v1582_v12, -inf }
 0x2aa   : > { %v1441_v14 = vpop.xlane.xlu0 %1440  ;;  %v1516_v15 = vsel %vm1438_vm6, %v1512_v13, -inf }
 0x2ab   : > { %v1445_v20 = vsub.f32 %v1436_v59, %v1441_v14  ;;  %1517 = vmax.xlane.f32.xlu1 %v1516_v15  ;;  %v1577_v18 = vpop.f32.mrf.mxu3  ;;  %1585 = vmax.xlane.f32.xlu2 %v1584_v19 }
 0x2ac   : > { %v1581_v21 = vmul.f32 0.35355338, %v1577_v18 }
 0x2ad   : > { %v1447_v22 = vmul.f32 1.442695, %v1445_v20  ;;  %v1646_v23 = vpop.f32.mrf.mxu1 }
 0x2ae   : > { %v1651_v24 = vmul.f32 0.35355338, %v1646_v23  ;;  %v1583_v25 = vadd.f32 %v1581_v21, %v1289_v61 }
 0x2af   : > { %2705 = vpow2.f32 %v1447_v22 }
 0x2b0   : > { %v1587_v26 = vsel %vm1438_vm6, %v1583_v25, -inf  ;;  %v1653_v27 = vadd.f32 %v1651_v24, %v1288_v55 }
 0x2b1   : > { %1588 = vmax.xlane.f32.xlu0 %v1587_v26 }
 0x2b2   : > { %v1444_v28 = vpop.xlane.xlu2 %1443  ;;  %v1655_v29 = vsel %vm1438_vm6, %v1653_v27, -inf }
 0x2b3   : > { %v1446_v30 = vsub.f32 %v1437_v0, %v1444_v28  ;;  %1656 = vmax.xlane.f32.xlu2 %v1655_v29 }
 0x2b5   : > { %v3743_v31 = vpop.eup %2705  ;;  %v1449_v32 = vmul.f32 1.442695, %v1446_v30  ;;  %v1648_v33 = vpop.f32.mrf.mxu1 }
 0x2b6   : > { %v1652_v34 = vmul.f32 0.35355338, %v1648_v33  ;;  %v1451_v35 = vsel %vm1438_vm6, %v3743_v31, 0.0 }
 0x2b7   : > { %2707 = vpow2.f32 %v1449_v32 }
 0x2b8   : > { %v1654_v36 = vadd.f32 %v1652_v34, %v1289_v61 }
 0x2b9   : > { %1452 = vadd.xlane.f32.xlu0 %v1451_v35 }
 0x2ba   : > { %v1658_v37 = vsel %vm1438_vm6, %v1654_v36, -inf }
 0x2bb   : > { %1659 = vmax.xlane.f32.xlu1 %v1658_v37 }
 0x2bd   : > { %v3748_v38 = vpop.eup %2707 }
 0x2be   : > { %v1454_v39 = vsel %vm1438_vm6, %v3748_v38, 0.0 }
 0x2c3   : > { %1455 = vadd.xlane.f32.xlu1 %v1454_v39 }
 0x316   : > { %v1515_v42 = vpop.xlane.xlu2 %1514 }
 0x317   : > { %v1519_v44 = vsub.f32 %v1511_v6, %v1515_v42 }
 0x319   : > { %v1521_v48 = vmul.f32 1.442695, %v1519_v44 }
 0x31b   : > { %2709 = vpow2.f32 %v1521_v48 }
 0x31e   : > { %v1518_v52 = vpop.xlane.xlu1 %1517  ;;  %v1586_v53 = vpop.xlane.xlu2 %1585 }
 0x31f   : > { %v1520_v55 = vsub.f32 %v1512_v13, %v1518_v52  ;;  %v1590_v56 = vsub.f32 %v1582_v12, %v1586_v53 }
 0x321   : > { %v2710_v57 = vpop.eup %2709  ;;  %v1523_v58 = vmul.f32 1.442695, %v1520_v55  ;;  %v1592_v59 = vmul.f32 1.442695, %v1590_v56 }
 0x322   : > { %v1525_v60 = vsel %vm1438_vm6, %v2710_v57, 0.0 }
 0x323   : > { %2711 = vpow2.f32 %v1523_v58  ;;  %1526 = vadd.xlane.f32.xlu1 %v1525_v60  ;;  %v2504_v60 = vld [vmem:[%s3637_s2 + $0x8] sm:$0xff] }
 0x324   : > { %2713 = vpow2.f32 %v1592_v59  ;;  %v1589_v61 = vpop.xlane.xlu0 %1588  ;;  %1759 = vmatpush.bf16.msra.mxu3 %v2504_v60 }
 0x325   : > { %v1591_v62 = vsub.f32 %v1583_v25, %v1589_v61  ;;  %v2503_v61 = vld [vmem:[%s3637_s2] sm:$0xff]  ;;  %s3950_s2 = scalar_lea.vmem [#allocation15], %s3628_s1 }
 0x326   : > { %v1657_v63 = vpop.xlane.xlu2 %1656 }
 0x327   : > { %v1594_v0 = vmul.f32 1.442695, %v1591_v62  ;;  %v1661_v1 = vsub.f32 %v1653_v27, %v1657_v63 }
 0x328   : > { %1760 = vmatpush.bf16.msra.mxu3 %v2503_v61 }
 0x329   : > { %v2712_v2 = vpop.eup %2711  ;;  %2715 = vpow2.f32 %v1594_v0  ;;  %v1663_v3 = vmul.f32 1.442695, %v1661_v1 }
 0x32a   : > { %v3755_v4 = vpop.eup %2713  ;;  %v1528_v5 = vsel %vm1438_vm6, %v2712_v2, 0.0 }
 0x32b   : > { %2717 = vpow2.f32 %v1663_v3  ;;  %1529 = vadd.xlane.f32.xlu2 %v1528_v5  ;;  %v1596_v6 = vsel %vm1438_vm6, %v3755_v4, 0.0 }
 0x32c   : > { %1597 = vadd.xlane.f32.xlu0 %v1596_v6  ;;  %v1453_v13 = vpop.xlane.xlu0 %1452 }
 0x32e   : > { %v1660_v7 = vpop.xlane.xlu1 %1659 }
 0x32f   : > { %v2716_v8 = vpop.eup %2715  ;;  %v1662_v9 = vsub.f32 %v1654_v36, %v1660_v7 }
 0x330   : > { %v1599_v10 = vsel %vm1438_vm6, %v2716_v8, 0.0 }
 0x331   : > { %v2718_v11 = vpop.eup %2717  ;;  %v1665_v12 = vmul.f32 1.442695, %v1662_v9  ;;  %1600 = vadd.xlane.f32.xlu1 %v1599_v10 }
 0x332   : > { %v1667_v14 = vsel %vm1438_vm6, %v2718_v11, 0.0 }
 0x333   : > { %2719 = vpow2.f32 %v1665_v12 }
 0x334   : > { %1668 = vadd.xlane.f32.xlu0 %v1667_v14  ;;  %2721 = vrcp.f32 %v1453_v13  ;;  %v2698_v14 = vld [vmem:[%s3950_s2] ss:$0 sm:$0xff] }
 0x336   : > { %v1456_v15 = vpop.xlane.xlu1 %1455 }
 0x337   : > { %2723 = vrcp.f32 %v1456_v15 }
 0x339   : > { %v2720_v19 = vpop.eup %2719 }
 0x33a   : > { %v1670_v20 = vsel %vm1438_vm6, %v2720_v19, 0.0  ;;  %v2722_v18 = vpop.eup %2721 }
 0x33b   : > { %1671 = vadd.xlane.f32.xlu1 %v1670_v20  ;;  %v1459_v22 = vmul.f32 %v2722_v18, %v3743_v31 }
 0x33d   : > { %v2724_v21 = vpop.eup %2723 }
 0x33e   : > { %v1460_v23 = vmul.f32 %v2724_v21, %v3748_v38 }
 0x340   : > { %v1461_v24 = vpack.c.bf16 %v1460_v23, %v1459_v22 }
 0x342   : > { %2439 = vmatmul.msk.bf16.vlgmr.msrb.gmra.mxu0 %vm1438_vm6, %v1461_v24 }
 0x343   : > { %1536 = vrot.lane.b32.xlu2 %v1466_v54, %s3281_s30 }
 0x348   : > { %1678 = vrot.lane.b32.xlu0 %v1466_v54, %s3282_s27 }
 0x354   : > { %1607 = vrot.lane.b32.xlu1 %v1466_v54, %s3280_s23 }
 0x396   : > { %v1527_v25 = vpop.xlane.xlu1 %1526 }
 0x397   : > { %2725 = vrcp.f32 %v1527_v25  ;;  %v3287_v25 = vmov 32.0  }
 0x39d   : > { %v2726_v27 = vpop.eup %2725 }
 0x39e   : > { %v1530_v26 = vpop.xlane.xlu2 %1529  ;;  %v1533_v30 = vmul.f32 %v2726_v27, %v2710_v57 }
 0x39f   : > { %2727 = vrcp.f32 %v1530_v26  ;;  %v1598_v28 = vpop.xlane.xlu0 %1597 }
 0x3a4   : > { %v1601_v32 = vpop.xlane.xlu1 %1600 }
 0x3a5   : > { %v2728_v29 = vpop.eup %2727 }
 0x3a6   : > { %v1534_v31 = vmul.f32 %v2728_v29, %v2712_v2  ;;  %v1537_v33 = vpop.permute.xlu2 %1536 }
 0x3a7   : > { %1549 = vmatpush.bf16.msrb.mxu2 %v1537_v33  ;;  %v1669_v35 = vpop.xlane.xlu0 %1668 }
 0x3a8   : > { %v1535_v34 = vpack.c.bf16 %v1534_v31, %v1533_v30 }
 0x3aa   : > { %2441 = vmatmul.msk.bf16.vlgmr.msrb.gmra.mxu2 %vm1438_vm6, %v1535_v34 }
 0x3ae   : > { %v1672_v36 = vpop.xlane.xlu1 %1671 }
 0x3af   : > { %2729 = vrcp.f32 %v1672_v36 }
 0x3b0   : > { %2731 = vrcp.f32 %v1669_v35 }
 0x3b1   : > { %2733 = vrcp.f32 %v1601_v32 }
 0x3b2   : > { %2735 = vrcp.f32 %v1598_v28 }
 0x3b3   : > { %2737 = vrcp.f32 %v3287_v25 }
 0x3b5   : > { %v2730_v37 = vpop.eup %2729 }
 0x3b6   : > { %v2732_v38 = vpop.eup %2731  ;;  %v1676_v39 = vmul.f32 %v2730_v37, %v2720_v19 }
 0x3b7   : > { %v1675_v40 = vmul.f32 %v2732_v38, %v2718_v11  ;;  %v2734_v43 = vpop.eup %2733 }
 0x3b8   : > { %v2736_v44 = vpop.eup %2735  ;;  %v1605_v45 = vmul.f32 %v2734_v43, %v2716_v8  ;;  %v2505_v43 = vld [vmem:[%s3642_s17] sm:$0xff] }
 0x3b9   : > { %v1677_v42 = vpack.c.bf16 %v1676_v39, %v1675_v40  ;;  %v1604_v46 = vmul.f32 %v2736_v44, %v3755_v4  ;;  %v2738_v26 = vpop.eup %2737  ;;  %v2506_v40 = vld [vmem:[%s3642_s17 + $0x8] sm:$0xff]  ;;  %s3951_s17 = scalar_lea.vmem [#allocation16], %s3628_s1 }
 0x3ba   : > { %v1679_v41 = vpop.permute.xlu0 %1678  ;;  %v1778_v27 = vmul.f32 32.0, %v2738_v26  ;;  %vm1782_vm9 = vweird.f32 %v2738_v26  ;;  %v2699_v60 = vld [vmem:[%s3951_s17] ss:$0 sm:$0xff] }
 0x3bb   : > { %1691 = vmatpush.bf16.msra.mxu2 %v1679_v41  ;;  %v1606_v48 = vpack.c.bf16 %v1605_v45, %v1604_v46 }
 0x3bc   : > { %v1779_v28 = vsub.f32 1.0, %v1778_v27 }
 0x3be   : > { %2445 = vmatmul.msk.bf16.vlgmr.msra.gmra.mxu2 %vm1438_vm6, %v1677_v42  ;;  %v1780_v29 = vmul.f32 %v2738_v26, %v1779_v28 }
 0x3bf   : > { %v1480_v50 = vpop.f32.mrf.mxu0 }
 0x3c0   : > { %v1781_v30 = vadd.f32 %v2738_v26, %v1780_v29 }
 0x3c6   : > { %v1608_v47 = vpop.permute.xlu1 %1607 }
 0x3c7   : > { %1620 = vmatpush.bf16.msra.mxu0 %v1608_v47  ;;  %v1482_v53 = vpop.f32.mrf.mxu0 }
 0x3ca   : > { %2443 = vmatmul.msk.bf16.vlgmr.msra.gmra.mxu0 %vm1438_vm6, %v1606_v48 }
 0x3cb   : > { %1862 = vmatpush.bf16.msrb.mxu0 %v2506_v40 }
 0x3cf   : > { %1863 = vmatpush.bf16.msrb.mxu0 %v2505_v43 }
 0x42d   : > { %v1551_v49 = vpop.f32.mrf.mxu2 }
 0x435   : > { %v1553_v51 = vpop.f32.mrf.mxu2 }
 0x436   : > { %v2679_v52 = vpack.i.bf16 %v1553_v51, %v1551_v49 }
 0x438   : > { %2680 = vrot.lane.b32.xlu2 %v2679_v52, %s3284_s0 }
 0x441   : > { %v1693_v54 = vpop.f32.mrf.mxu2 }
 0x447   : > { %v1622_v55 = vpop.f32.mrf.mxu0 }
 0x449   : > { %v1695_v56 = vpop.f32.mrf.mxu2 }
 0x44a   : > { %v2689_v57 = vpack.i.bf16 %v1695_v56, %v1693_v54 }
 0x44c   : > { %2690 = vrot.lane.b32.xlu0 %v2689_v57, %s3285_s24 }
 0x44f   : > { %v1624_v58 = vpop.f32.mrf.mxu0 }
 0x450   : > { %v2684_v59 = vpack.i.bf16 %v1624_v58, %v1622_v55 }
 0x452   : > { %2685 = vrot.lane.b32.xlu2 %v2684_v59, %s3286_s29 }
 0x492   : > { %v2681_v62 = vpop.permute.xlu2 %2680 }
 0x493   : > { %v2683_v0 = vunpack.i.h.bf16 %v2681_v62  ;;  %v2682_v1 = vunpack.i.l.bf16 %v2681_v62 }
 0x495   : > { %v1723_v5 = vsel %vm1413_vm4, %v1482_v53, %v2683_v0  ;;  %v1722_v6 = vsel %vm1413_vm4, %v1480_v50, %v2682_v1  ;;  %v2700_v0 = vld [vmem:[%s3952_s9] ss:$0 sm:$0xff] }
 0x4ac   : > { %v2686_v63 = vpop.permute.xlu2 %2685 }
 0x4ad   : > { %v2688_v2 = vunpack.i.h.bf16 %v2686_v63  ;;  %v2687_v3 = vunpack.i.l.bf16 %v2686_v63 }
 0x4af   : > { %v1724_v9 = vsel %vm1438_vm6, %v1722_v6, %v2687_v3  ;;  %v1725_v10 = vsel %vm1438_vm6, %v1723_v5, %v2688_v2 }
 0x4be   : > { %v2691_v4 = vpop.permute.xlu0 %2690 }
 0x4bf   : > { %v2693_v7 = vunpack.i.h.bf16 %v2691_v4  ;;  %v2692_v8 = vunpack.i.l.bf16 %v2691_v4 }
 0x4c1   : > { %v1728_v11 = vsel %vm1726_vm8, %v1725_v10, %v2693_v7  ;;  %v1727_v12 = vsel %vm1726_vm8, %v1724_v9, %v2692_v8  ;;  %v2510_v7 = vld [vmem:[%s3678_s28 + $0x18] sm:$0xff]  ;;  %v2509_v8 = vld [vmem:[%s3678_s28 + $0x10] sm:$0xff]  ;;  %v2508_v9 = vld [vmem:[%s3678_s28 + $0x8] sm:$0xff] }
 0x4c2   : > { %v1729_v13 = vpack.c.bf16 %v1728_v11, %v1727_v12  ;;  %1917 = vmatpush.bf16.msrb.mxu1 %v2510_v7  ;;  %v2507_v10 = vld [vmem:[%s3678_s28] sm:$0xff]  ;;  %s3955_s28 = scalar_lea.vmem [#allocation20], %s3628_s1  ;;  %s3957_s1 = sld [smem:[#allocation29_spill]] }
 0x4c3   : > { %v2701_v12 = vld [vmem:[%s3953_s7] ss:$0 sm:$0xff] }
 0x4c4   : > { %2454 = vmatmul.msk.bf16.vlgmr.msra.gmra.mxu3 %vm1311_vm3, %v1729_v13 }
 0x4c6   : > { %1918 = vmatpush.bf16.msrb.mxu1 %v2509_v8 }
 0x4c8   : > { %p2481_p3 = scmp.ne.s32.totalorder %s3957_s1, 1 }
 0x4ca   : > { %1919 = vmatpush.bf16.msrb.mxu1 %v2508_v9 }
 0x4ce   : > { %1920 = vmatpush.bf16.msrb.mxu1 %v2507_v10 }
 0x547   : > { %v1762_v15 = vpop.f32.mrf.mxu3 }
 0x548   : > { %v1763_v19 = vadd.f32 %v2698_v14, %v1762_v15 }
 0x54a   : > { %v1767_v20 = vadd.f32 %v1763_v19, %v3693_v16  ;;  %v3786_v16 = vsel %vm1782_vm9, %v2738_v26, %v1781_v30 }
 0x54c   : > { %v1771_v18 = vsel %vm1311_vm3, %v1767_v20, 0.0 }
 0x54d   : > { %1772 = vadd.xlane.f32.xlu2 %v1771_v18 }
 0x54f   : > { %v1764_v21 = vpop.f32.mrf.mxu3 }
 0x550   : > { %v1765_v22 = vadd.f32 %v2698_v14, %v1764_v21  ;;  %v2702_v21 = vld [vmem:[%s1208_s20] ss:$0 sm:$0xff] }
 0x552   : > { %v1768_v23 = vadd.f32 %v1765_v22, %v3695_v17 }
 0x554   : > { %v1774_v24 = vsel %vm1311_vm3, %v1768_v23, 0.0 }
 0x555   : > { %1775 = vadd.xlane.f32.xlu1 %v1774_v24 }
 0x5c0   : > { %v1773_v31 = vpop.xlane.xlu2 %1772 }
 0x5c1   : > { %v1784_v32 = vmul.f32 %v3786_v16, %v1773_v31 }
 0x5c3   : > { %v1786_v33 = vsub.f32 %v1767_v20, %v1784_v32 }
 0x5c5   : > { %v1788_v17 = vmul.f32 %v1786_v33, %v1786_v33 }
 0x5c7   : > { %v1790_v34 = vsel %vm1311_vm3, %v1788_v17, 0.0 }
 0x5c8   : > { %v1776_v35 = vpop.xlane.xlu1 %1775  ;;  %1791 = vadd.xlane.f32.xlu0 %v1790_v34 }
 0x5c9   : > { %v1785_v36 = vmul.f32 %v3786_v16, %v1776_v35 }
 0x5cb   : > { %v1787_v37 = vsub.f32 %v1768_v23, %v1785_v36 }
 0x5cd   : > { %v1789_v38 = vmul.f32 %v1787_v37, %v1787_v37 }
 0x5cf   : > { %v1793_v39 = vsel %vm1311_vm3, %v1789_v38, 0.0 }
 0x5d0   : > { %1794 = vadd.xlane.f32.xlu2 %v1793_v39 }
 0x63b   : > { %v1792_v41 = vpop.xlane.xlu0 %1791 }
 0x63c   : > { %v1796_v42 = vmul.f32 %v1792_v41, %v3786_v16 }
 0x63e   : > { %v1798_v44 = vadd.f32 1e-05, %v1796_v42 }
 0x640   : > { %2739 = vrsqrt.f32 %v1798_v44  ;;  %vm1806_vm11 = vweird.f32 %v1798_v44 }
 0x643   : > { %v1795_v45 = vpop.xlane.xlu2 %1794 }
 0x644   : > { %v1797_v46 = vmul.f32 %v1795_v45, %v3786_v16 }
 0x646   : > { %v2740_v47 = vpop.eup %2739  ;;  %v1799_v48 = vadd.f32 1e-05, %v1797_v46 }
 0x647   : > { %v1801_v49 = vmul.f32 %v2740_v47, %v1798_v44  ;;  %vm1807_vm10 = vweird.f32 %v2740_v47 }
 0x648   : > { %2741 = vrsqrt.f32 %v1799_v48  ;;  %vm1808_vm12 = vmor %vm1806_vm11, %vm1807_vm10  ;;  %vm1816_vm14 = vweird.f32 %v1799_v48 }
 0x649   : > { %v1802_v50 = vmul.f32 %v2740_v47, %v1801_v49 }
 0x64b   : > { %v1803_v51 = vmul.f32 0.5, %v1802_v50 }
 0x64d   : > { %v1804_v52 = vsub.f32 1.5, %v1803_v51 }
 0x64e   : > { %v2742_v53 = vpop.eup %2741 }
 0x64f   : > { %v1805_v54 = vmul.f32 %v2740_v47, %v1804_v52  ;;  %v1811_v55 = vmul.f32 %v2742_v53, %v1799_v48  ;;  %vm1817_vm13 = vweird.f32 %v2742_v53 }
 0x650   : > { %vm1818_vm15 = vmor %vm1816_vm14, %vm1817_vm13 }
 0x651   : > { %v1812_v56 = vmul.f32 %v2742_v53, %v1811_v55  ;;  %v1809_v57 = vsel %vm1808_vm12, %v2740_v47, %v1805_v54 }
 0x652   : > { %v1820_v61 = vmul.f32 %v1809_v57, %v1786_v33 }
 0x653   : > { %v1813_v58 = vmul.f32 0.5, %v1812_v56 }
 0x654   : > { %v1825_v1 = vmul.f32 %v2699_v60, %v1820_v61 }
 0x655   : > { %v1814_v59 = vsub.f32 1.5, %v1813_v58 }
 0x656   : > { %v1830_v4 = vadd.f32 %v2700_v0, %v1825_v1 }
 0x657   : > { %v1815_v62 = vmul.f32 %v2742_v53, %v1814_v59 }
 0x659   : > { %v1819_v63 = vsel %vm1818_vm15, %v2742_v53, %v1815_v62  ;;  %v2703_v53 = vld [vmem:[%s3955_s28] ss:$0 sm:$0xff] }
 0x65a   : > { %v1821_v2 = vmul.f32 %v1819_v63, %v1787_v37 }
 0x65c   : > { %v1826_v3 = vmul.f32 %v2699_v60, %v1821_v2 }
 0x65e   : > { %v1831_v5 = vadd.f32 %v2700_v0, %v1826_v3 }
 0x660   : > { %v1832_v6 = vpack.c.bf16 %v1831_v5, %v1830_v4 }
 0x662   : > { %2463 = vmatmul.msk.bf16.vlgmr.msrb.gmra.mxu0 %vm1311_vm3, %v1832_v6 }
 0x6df   : > { %v1865_v11 = vpop.f32.mrf.mxu0 }
 0x6e0   : > { %v1866_v13 = vadd.f32 %v2701_v12, %v1865_v11 }
 0x6e2   : > { %v1870_v19 = vmax.f32 %v1866_v13, 0.0 }
 0x6e7   : > { %v1867_v14 = vpop.f32.mrf.mxu0 }
 0x6e8   : > { %v1868_v15 = vadd.f32 %v2701_v12, %v1867_v14 }
 0x6ea   : > { %v1871_v20 = vmax.f32 %v1868_v15, 0.0 }
 0x6ec   : > { %v1872_v18 = vpack.c.bf16 %v1871_v20, %v1870_v19 }
 0x6ee   : > { %2480 = vmatmul.msk.bf16.vlgmr.msrb.gmra.mxu1 %vm1909_vm0, %v1872_v18 }
 0x76b   : > { %v1922_v22 = vpop.f32.mrf.mxu1 }
 0x76c   : > { %v1923_v23 = vadd.f32 %v2702_v21, %v1922_v22 }
 0x76e   : > { %v1927_v24 = vadd.f32 %v1923_v23, %v1830_v4 }
 0x770   : > { %v1931_v25 = vsel %vm1311_vm3, %v1927_v24, 0.0 }
 0x771   : > { %1932 = vadd.xlane.f32.xlu1 %v1931_v25 }
 0x773   : > { %v1924_v26 = vpop.f32.mrf.mxu1 }
 0x774   : > { %v1925_v27 = vadd.f32 %v2702_v21, %v1924_v26 }
 0x776   : > { %v1928_v28 = vadd.f32 %v1925_v27, %v1831_v5 }
 0x778   : > { %v1934_v29 = vsel %vm1311_vm3, %v1928_v28, 0.0 }
 0x779   : > { %1935 = vadd.xlane.f32.xlu0 %v1934_v29 }
 0x7e4   : > { %v1933_v30 = vpop.xlane.xlu1 %1932 }
 0x7e5   : > { %v1937_v31 = vmul.f32 %v1933_v30, %v3786_v16 }
 0x7e7   : > { %v1939_v32 = vsub.f32 %v1927_v24, %v1937_v31 }
 0x7e9   : > { %v1941_v33 = vmul.f32 %v1939_v32, %v1939_v32 }
 0x7eb   : > { %v1943_v17 = vsel %vm1311_vm3, %v1941_v33, 0.0 }
 0x7ec   : > { %v1936_v34 = vpop.xlane.xlu0 %1935  ;;  %1944 = vadd.xlane.f32.xlu2 %v1943_v17 }
 0x7ed   : > { %v1938_v35 = vmul.f32 %v1936_v34, %v3786_v16 }
 0x7ef   : > { %v1940_v36 = vsub.f32 %v1928_v28, %v1938_v35 }
 0x7f1   : > { %v1942_v37 = vmul.f32 %v1940_v36, %v1940_v36 }
 0x7f3   : > { %v1946_v38 = vsel %vm1311_vm3, %v1942_v37, 0.0 }
 0x7f4   : > { %1947 = vadd.xlane.f32.xlu1 %v1946_v38 }
 0x85f   : > { %v1945_v39 = vpop.xlane.xlu2 %1944 }
 0x860   : > { %v1949_v40 = vmul.f32 %v1945_v39, %v3786_v16 }
 0x862   : > { %v1951_v41 = vadd.f32 1e-05, %v1949_v40 }
 0x864   : > { %2743 = vrsqrt.f32 %v1951_v41  ;;  %vm1959_vm2 = vweird.f32 %v1951_v41 }
 0x867   : > { %v1948_v42 = vpop.xlane.xlu1 %1947 }
 0x868   : > { %v1950_v43 = vmul.f32 %v1948_v42, %v3786_v16  ;;  %v2704_v16 = vld [vmem:[%s1211_s10] ss:$0 sm:$0xff] }
 0x86a   : > { %v2744_v44 = vpop.eup %2743  ;;  %v1952_v45 = vadd.f32 1e-05, %v1950_v43 }
 0x86b   : > { %v1954_v46 = vmul.f32 %v2744_v44, %v1951_v41  ;;  %vm1960_vm1 = vweird.f32 %v2744_v44 }
 0x86c   : > { %2745 = vrsqrt.f32 %v1952_v45  ;;  %vm1961_vm4 = vmor %vm1959_vm2, %vm1960_vm1  ;;  %vm1969_vm6 = vweird.f32 %v1952_v45 }
 0x86d   : > { %v1955_v47 = vmul.f32 %v2744_v44, %v1954_v46 }
 0x86f   : > { %v1956_v48 = vmul.f32 0.5, %v1955_v47 }
 0x871   : > { %v1957_v49 = vsub.f32 1.5, %v1956_v48 }
 0x872   : > { %v2746_v50 = vpop.eup %2745 }
 0x873   : > { %v1958_v51 = vmul.f32 %v2744_v44, %v1957_v49  ;;  %v1964_v52 = vmul.f32 %v2746_v50, %v1952_v45  ;;  %vm1970_vm5 = vweird.f32 %v2746_v50 }
 0x874   : > { %vm1971_vm7 = vmor %vm1969_vm6, %vm1970_vm5 }
 0x875   : > { %v1962_v54 = vsel %vm1961_vm4, %v2744_v44, %v1958_v51  ;;  %v1965_v55 = vmul.f32 %v2746_v50, %v1964_v52 }
 0x876   : > { %v1973_v56 = vmul.f32 %v1962_v54, %v1939_v32 }
 0x877   : > { %v1966_v57 = vmul.f32 0.5, %v1965_v55 }
 0x878   : > { %v1978_v58 = vmul.f32 %v2703_v53, %v1973_v56 }
 0x879   : > { %v1967_v59 = vsub.f32 1.5, %v1966_v57 }
 0x87a   : > { %v1983_v60 = vadd.f32 %v2704_v16, %v1978_v58 }
 0x87b   : > { %v1968_v61 = vmul.f32 %v2746_v50, %v1967_v59 }
 0x87c   : > { %1985 = vst.msk [vmem:[#allocation2] sm:$0xff] %vm1311_vm3, %v1983_v60 }
 0x87d   : > { %v1972_v62 = vsel %vm1971_vm7, %v2746_v50, %v1968_v61 }
 0x87e   : > { %v1974_v63 = vmul.f32 %v1972_v62, %v1940_v36 }
 0x880   : > { %v1979_v0 = vmul.f32 %v2703_v53, %v1974_v63  ;;  %1990 = sbr.rel (%p2481_p3) target bundleno = 2348 (0x92c), region = 176 }
 0x882   : > { %v1984_v1 = vadd.f32 %v2704_v16, %v1979_v0 }
 0x884   : > { %1986 = vst.msk [vmem:[#allocation2 + $0x8] sm:$0xff] %vm1311_vm3, %v1984_v1 }
 0x885   : > { %v1992_v2 = vpack.c.bf16 %v1984_v1, %v1983_v60  ;;  %v1993_v3 = vld [vmem:[#allocation3] sm:$0x1]  ;;  %v3288_v4 = vmov 0   ;;  %v1991_v6 = vld [vmem:[#allocation21] sm:$0x1]  ;;  %vm2038_vm10 = vcmask 122880  }
 0x886   : > { %2747 = vset.pattern.permute.xlu0 %v3288_v4 }
 0x887   : > { %v2004_v5 = vsel %vm1311_vm3, %v1992_v2, 0  ;;  %1996 = vperm.xlu0 %2747, %v1993_v3  }
 0x888   : > { %2013 = vmatpush.bf16.xpose.msra.mxu0 %v2004_v5 }
 0x88f   : > { %2482 = vmatmul.msk.bf16.vlgmr.msra.gmra.mxu0 %vm1311_vm3, %v1991_v6 }
 0x8f9   : > { %v1997_v7 = vpop.permute.xlu0 %1996 }
 0x8fa   : > { %v1999_v8 = vperm.slane %v1997_v7, 0 }
 0x90c   : > { %v2015_v9 = vpop.f32.mrf.mxu0 }
 0x90d   : > { %v2016_v10 = vadd.f32 %v2015_v9, %v1999_v8 }
 0x90f   : > { %v2483_v11 = vmul.f32 -1.442695, %v2016_v10 }
 0x911   : > { %2748 = vpow2.f32 %v2483_v11 }
 0x914   : > { %v2017_v12 = vpop.f32.mrf.mxu0 }
 0x917   : > { %v2749_v13 = vpop.eup %2748 }
 0x918   : > { %v2022_v14 = vadd.f32 1.0, %v2749_v13 }
 0x91a   : > { %2750 = vrcp.f32 %v2022_v14  ;;  %v2034_v18 = vand.u32 2147483648, %v2022_v14  ;;  %v2032_v22 = vand.u32 2147483647, %v2022_v14  ;;  %vm2028_vm9 = vweird.f32 %v2022_v14 }
 0x91c   : > { %v2035_v24 = vor.u32 1.1754944e-38, %v2034_v18  ;;  %vm2033_vm11 = vcmp.eq.f32.partialorder %v2032_v22, 8.507059e+37 }
 0x920   : > { %v2751_v15 = vpop.eup %2750 }
 0x921   : > { %v2024_v19 = vmul.f32 %v2751_v15, %v2022_v14  ;;  %vm2029_vm8 = vweird.f32 %v2751_v15 }
 0x922   : > { %vm2030_vm3 = vmor %vm2028_vm9, %vm2029_vm8 }
 0x923   : > { %v2025_v20 = vsub.f32 1.0, %v2024_v19 }
 0x925   : > { %v2026_v21 = vmul.f32 %v2751_v15, %v2025_v20 }
 0x927   : > { %v2027_v23 = vadd.f32 %v2751_v15, %v2026_v21 }
 0x929   : > { %v2031_v25 = vsel %vm2030_vm3, %v2751_v15, %v2027_v23 }
 0x92a   : > { %v2036_v26 = vsel %vm2033_vm11, %v2035_v24, %v2031_v25 }
 0x92b   : > { %2039 = vst.msk [vmem:[#allocation22] sm:$0x1] %vm2038_vm10, %v2036_v26 }
 0x92c PF: > { %p2608_p4 = scmp.eq.s32.totalorder %s3442_s22, 1  ;;  %s3958_s23 = sld [smem:[#allocation54_spill]] }
 0x92d   : > { %s3289_s27 = smov [#allocation22]  }
 0x92e   : > { %s2047_s8 = sshll.u32 %s3289_s27, 4  ;;  %s2048_s8 = int_to_ptr.vmem [resolvable:$true] %s2047_s8 }
 0x932   : > { %s2049_s30 = sshll.u32 %s3958_s23, 4  ;;  %s2050_s30 = int_to_ptr.hbm [resolvable:$true] %s2049_s30 }
 0x933   : > { %2550 = dma.vmem_to_hbm [thread:$0]  (%p2608_p4), %s2048_s8, 16, %s2050_s30, [#allocation6]  }
 0x934   : > { %3245 = dma.done.wait (%p2608_p4), [#allocation6], 16  }
 0x935   : > { %3247 = vsyncadd (%p2608_p4), [#allocation6], 4294967280 }
 0x936 PF: > { %s3959_s13 = sld [smem:[#allocation30_spill]]  ;;  %s3962_s24 = smov %s3254_s25 }
 0x937   : > { %s3960_s6 = sld [smem:[#allocation32_spill]]  ;;  %s3963_s25 = smov %s3258_s5 }
 0x938   : > { %s3961_s22 = sld [smem:[#allocation31_spill]]  ;;  %s3965_s1 = smov %s3266_s26 }
 0x93c   : > { %s39_s2 = sadd.s32 1, %s3959_s13  }
 0x93d   : > { %p36_p5 = scmp.ge.s32.totalorder %s39_s2, 4   ;;  %s3964_s5 = smov %s3960_s6 }
 0x93e   : > { %s3966_s26 = smov %s3961_s22 }
 0x93f   :  { %38 = sbr.rel (!%p36_p5) target bundleno = 29 (0x1d), region = 288 }
 0x944   :  { %2063 = vsyncpa [#allocation5], 1 }
 0x945   :  { %2065 = vsyncpa [#allocation5 + $0x1], 1 }
 0x946   :  { %2066 = vsyncpa [#allocation8], 1 }
 0x947   :  { %2067 = vsyncpa [#allocation11], 1 }
 0x948   :  { %2068 = vsyncpa [#allocation6], 1 }
 0x949   :  { %2070 = vsyncpa [#allocation6 + $0x1], 1 }

</bundles_post_ra>
